<compile_context>
chip_gen: v7x
topology: tpu7x:2x2x1
jax: 0.10.0
libtpu: 0.0.40
codegen_flags: <defaults>
</compile_context>

<pallas_src>
import functools
import numpy as np
import jax
import jax.numpy as jnp
from jax import lax
from jax.experimental import pallas as pl
from jax.experimental.pallas import tpu as pltpu


# --------------------------------------------------------------------------
# Fused kernel: encoders (step 0) + one GraphTransformer layer per grid step.
# --------------------------------------------------------------------------
def _fused_gt_kernel(node_in_ref, edge_in_ref,
                     enc_nw_ref, enc_nb_ref, enc_ew_ref, enc_eb_ref,
                     gsrc_ref, gdst_ref, hsum_ref,
                     wq_ref, wk_ref, wv_ref, we_ref,
                     w1n_ref, w2n_ref, w1e_ref, w2e_ref,
                     node_out_ref,
                     node_st, edge_st,
                     *, inv_sqrt_d, num_gt_layers):
    dot = lambda a, b: jnp.dot(a, b, preferred_element_type=jnp.float32)
    l = pl.program_id(0)

    # --- encoders: run once, result kept resident in VMEM scratch ---------
    @pl.when(l == 0)
    def _():
        node_st[...] = dot(node_in_ref[...], enc_nw_ref[...]) + enc_nb_ref[...]
        edge_st[...] = dot(edge_in_ref[...], enc_ew_ref[...]) + enc_eb_ref[...]

    node = node_st[...]                              # (N, H) f32
    edge = edge_st[...]                              # (E, H) f32
    gsrc = gsrc_ref[...].astype(jnp.float32)         # (E, N) one-hot src gather
    gdst = gdst_ref[...].astype(jnp.float32)         # (E, N) one-hot dst gather
    hsum = hsum_ref[...].astype(jnp.float32)         # (H, H) per-head sum+bcast

    # --- multi-head Q/K/V and edge projections (heads flat along lanes) ---
    qh = dot(node, wq_ref[...])
    kh = dot(node, wk_ref[...])
    vh = dot(node, wv_ref[...])
    pe = dot(edge, we_ref[...])

    # --- gather endpoint features onto edges (one-hot matmuls, MXU) -------
    k_src = dot(gsrc, kh)                            # K_h[src]
    q_dst = dot(gdst, qh)                            # Q_h[dst]
    v_src = dot(gsrc, vh)                            # V_h[src]

    # --- per-edge, per-head attention scores (DGL propagate_attention) ----
    score = jnp.clip(k_src * q_dst * inv_sqrt_d, -5.0, 5.0) * pe     # (E, H)
    # per-head sum broadcast back across that head's d lanes via block-diag
    s = jnp.exp(jnp.clip(dot(score, hsum), -5.0, 5.0))               # (E, H)

    # --- scatter-sum to destination nodes: reuse gdst, contract edge dim --
    wv = lax.dot_general(gdst, v_src * s, (((0,), (0,)), ((), ())),
                         preferred_element_type=jnp.float32)          # (N, H)
    z = lax.dot_general(gdst, s, (((0,), (0,)), ((), ())),
                        preferred_element_type=jnp.float32)           # (N, H)
    h = wv / (z + 1e-6)

    # --- node / edge MLPs: Linear(H,2H) -> SiLU -> (dropout=id) -> Linear --
    hn = dot(h, w1n_ref[...])
    hn = hn * jax.nn.sigmoid(hn)
    node_st[...] = dot(hn, w2n_ref[...])

    he = dot(score, w1e_ref[...])                    # e_out == score
    he = he * jax.nn.sigmoid(he)
    edge_st[...] = dot(he, w2e_ref[...])

    # --- finalize ----------------------------------------------------------
    @pl.when(l == num_gt_layers - 1)
    def _():
        node_out_ref[...] = node_st[...]


# --------------------------------------------------------------------------
# Full DGLGraphTransformer forward (single pallas_call).
# --------------------------------------------------------------------------
def dgl_graph_transformer(node_feats, edge_feats, src, dst, params, num_heads):
    enc_n_w, enc_n_b, enc_e_w, enc_e_b, layers = params
    N, Cin = node_feats.shape
    E, Ce = edge_feats.shape
    H = enc_n_w.shape[1]
    H2 = 2 * H
    d = H // num_heads
    L = len(layers)
    assert L >= 1, "expects at least one GraphTransformerModule"

    # Graph structure as dense one-hot operators (exact in bf16: 0/1 values).
    gsrc = jax.nn.one_hot(src, N, dtype=jnp.bfloat16)        # (E, N)
    gdst = jax.nn.one_hot(dst, N, dtype=jnp.bfloat16)        # (E, N)
    # (H, H) block-diagonal of ones: per-head sum + broadcast in one matmul.
    head_bcast = jnp.asarray(
        (np.arange(H)[:, None] // d) == (np.arange(H)[None, :] // d),
        dtype=jnp.bfloat16)

    # Stack per-layer weights along a leading layer axis for BlockSpec slicing.
    stacked = [jnp.stack([lp[i] for lp in layers]) for i in range(8)]

    kernel = functools.partial(_fused_gt_kernel,
                               inv_sqrt_d=float(1.0 / np.sqrt(d)),
                               num_gt_layers=L)

    const2 = lambda shape: pl.BlockSpec(shape, lambda l: (0, 0))
    perlayer = lambda shape: pl.BlockSpec((None,) + shape, lambda l: (l, 0, 0))

    in_specs = [
        const2((N, Cin)),          # node_feats
        const2((E, Ce)),           # edge_feats
        const2((Cin, H)),          # node_encoder W
        const2((1, H)),            # node_encoder b
        const2((Ce, H)),           # edge_encoder W
        const2((1, H)),            # edge_encoder b
        const2((E, N)),            # gsrc (bf16)
        const2((E, N)),            # gdst (bf16)
        const2((H, H)),            # head_bcast (bf16)
        perlayer((H, H)),          # Wq
        perlayer((H, H)),          # Wk
        perlayer((H, H)),          # Wv
        perlayer((H, H)),          # We
        perlayer((H, H2)),         # node MLP W1
        perlayer((H2, H)),         # node MLP W2
        perlayer((H, H2)),         # edge MLP W1
        perlayer((H2, H)),         # edge MLP W2
    ]

    return pl.pallas_call(
        kernel,
        grid=(L,),
        out_shape=jax.ShapeDtypeStruct((N, H), jnp.float32),
        in_specs=in_specs,
        out_specs=pl.BlockSpec((N, H), lambda l: (0, 0)),
        scratch_shapes=[pltpu.VMEM((N, H), jnp.float32),   # node state
                        pltpu.VMEM((E, H), jnp.float32)],  # edge state
        compiler_params=pltpu.CompilerParams(
            dimension_semantics=("arbitrary",)),
    )(node_feats, edge_feats,
      enc_n_w, enc_n_b.reshape(1, -1), enc_e_w, enc_e_b.reshape(1, -1),
      gsrc, gdst, head_bcast, *stacked)


# --------------------------------------------------------------------------
# Pure-JAX reference (mirrors the PyTorch / DGL semantics) for validation.
# --------------------------------------------------------------------------
def reference_forward(node_feats, edge_feats, src, dst, params, num_heads):
    enc_n_w, enc_n_b, enc_e_w, enc_e_b, layers = params
    H = enc_n_w.shape[1]
    d = H // num_heads
    node = node_feats @ enc_n_w + enc_n_b
    edge = edge_feats @ enc_e_w + enc_e_b
    N, E = node.shape[0], edge.shape[0]
    for (wq, wk, wv, we, w1n, w2n, w1e, w2e) in layers:
        qh = (node @ wq).reshape(N, num_heads, d)
        kh = (node @ wk).reshape(N, num_heads, d)
        vh = (node @ wv).reshape(N, num_heads, d)
        pe = (edge @ we).reshape(E, num_heads, d)
        score = kh[src] * qh[dst]
        score = jnp.clip(score / np.sqrt(d), -5.0, 5.0) * pe
        e_out = score
        s = jnp.exp(jnp.clip(score.sum(-1, keepdims=True), -5.0, 5.0))
        wV = jax.ops.segment_sum(vh[src] * s, dst, num_segments=N)
        z = jax.ops.segment_sum(s, dst, num_segments=N)
        h = (wV / (z + 1e-6)).reshape(N, H)
        e = e_out.reshape(E, H)
        h1 = h @ w1n
        node = (h1 * jax.nn.sigmoid(h1)) @ w2n
        e1 = e @ w1e
        edge = (e1 * jax.nn.sigmoid(e1)) @ w2e
    return node


# --------------------------------------------------------------------------
# Deterministic parameter init (glorot-style scaled normal; scale=2.0).
# --------------------------------------------------------------------------
def glorot(key, fan_in, fan_out):
    std = np.sqrt(2.0 * 2.0 / (fan_in + fan_out))
    return std * jax.random.normal(key, (fan_in, fan_out), dtype=jnp.float32)


if __name__ == "__main__":
    # Small node/edge counts; hidden size kept at the module default (128)
    # so the lane dimension is dense.
    N, E = 16, 48                         # nodes, edges
    in_channels, edge_features = 12, 6
    H, num_heads, num_layers = 128, 4, 4  # module defaults

    root = jax.random.PRNGKey(0)
    k_inputs, k_graph, k_params = jax.random.split(root, 3)

    kn, ke = jax.random.split(k_inputs)
    node_feats = jax.random.normal(kn, (N, in_channels), dtype=jnp.float32)
    edge_feats = jax.random.normal(ke, (E, edge_features), dtype=jnp.float32)

    ks, kd = jax.random.split(k_graph)
    src = jax.random.randint(ks, (E,), 0, N)
    dst = jax.random.randint(kd, (E,), 0, N)

    pkeys = iter(jax.random.split(k_params, 4 + 8 * (num_layers - 1)))
    enc_n_w = glorot(next(pkeys), in_channels, H)
    enc_n_b = jnp.zeros((H,), jnp.float32)
    enc_e_w = glorot(next(pkeys), edge_features, H)
    enc_e_b = jnp.zeros((H,), jnp.float32)
    layers = []
    for _ in range(num_layers - 1):
        wq = glorot(next(pkeys), H, H)
        wk = glorot(next(pkeys), H, H)
        wv = glorot(next(pkeys), H, H)
        we = glorot(next(pkeys), H, H)
        w1n = glorot(next(pkeys), H, 2 * H)
        w2n = glorot(next(pkeys), 2 * H, H)
        w1e = glorot(next(pkeys), H, 2 * H)
        w2e = glorot(next(pkeys), 2 * H, H)
        layers.append((wq, wk, wv, we, w1n, w2n, w1e, w2e))
    params = (enc_n_w, enc_n_b, enc_e_w, enc_e_b, layers)

    out = dgl_graph_transformer(node_feats, edge_feats, src, dst, params,
                                num_heads)
    out = jax.block_until_ready(out)

    ref = jax.block_until_ready(
        reference_forward(node_feats, edge_feats, src, dst, params, num_heads))

    if not np.allclose(np.asarray(out), np.asarray(ref), rtol=5e-3, atol=5e-3):
        raise AssertionError("Pallas kernel output does not match reference")
    print("KERNEL_OK")
</pallas_src>

<mosaic_0001>
module attributes {stable_mosaic.version = 11 : i64} {
  func.func @_fused_gt_kernel(%arg0: i32, %arg1: memref<16x12xf32, #tpu.memory_space<vmem>>, %arg2: memref<48x6xf32, #tpu.memory_space<vmem>>, %arg3: memref<12x128xf32, #tpu.memory_space<vmem>>, %arg4: memref<1x128xf32, #tpu.memory_space<vmem>>, %arg5: memref<6x128xf32, #tpu.memory_space<vmem>>, %arg6: memref<1x128xf32, #tpu.memory_space<vmem>>, %arg7: memref<48x16xbf16, #tpu.memory_space<vmem>>, %arg8: memref<48x16xbf16, #tpu.memory_space<vmem>>, %arg9: memref<128x128xbf16, #tpu.memory_space<vmem>>, %arg10: memref<1x128x128xf32, #tpu.memory_space<vmem>>, %arg11: memref<1x128x128xf32, #tpu.memory_space<vmem>>, %arg12: memref<1x128x128xf32, #tpu.memory_space<vmem>>, %arg13: memref<1x128x128xf32, #tpu.memory_space<vmem>>, %arg14: memref<1x128x256xf32, #tpu.memory_space<vmem>>, %arg15: memref<1x256x128xf32, #tpu.memory_space<vmem>>, %arg16: memref<1x128x256xf32, #tpu.memory_space<vmem>>, %arg17: memref<1x256x128xf32, #tpu.memory_space<vmem>>, %arg18: memref<16x128xf32, #tpu.memory_space<vmem>>, %arg19: memref<16x128xf32, #tpu.memory_space<vmem>>, %arg20: memref<48x128xf32, #tpu.memory_space<vmem>>) attributes {dimension_semantics = [#tpu.dimension_semantics<arbitrary>], iteration_bounds = array<i64: 3>, scalar_prefetch = 0 : i64, scratch_operands = 2 : i64, tpu.core_type = #tpu.core_type<tc>, window_params = [{pipeline_mode = #tpu.pipeline_mode<synchronous>, transform_indices = @transform_0, window_bounds = array<i64: 16, 12>}, {pipeline_mode = #tpu.pipeline_mode<synchronous>, transform_indices = @transform_1, window_bounds = array<i64: 48, 6>}, {pipeline_mode = #tpu.pipeline_mode<synchronous>, transform_indices = @transform_2, window_bounds = array<i64: 12, 128>}, {pipeline_mode = #tpu.pipeline_mode<synchronous>, transform_indices = @transform_3, window_bounds = array<i64: 1, 128>}, {pipeline_mode = #tpu.pipeline_mode<synchronous>, transform_indices = @transform_4, window_bounds = array<i64: 6, 128>}, {pipeline_mode = #tpu.pipeline_mode<synchronous>, transform_indices = @transform_5, window_bounds = array<i64: 1, 128>}, {pipeline_mode = #tpu.pipeline_mode<synchronous>, transform_indices = @transform_6, window_bounds = array<i64: 48, 16>}, {pipeline_mode = #tpu.pipeline_mode<synchronous>, transform_indices = @transform_7, window_bounds = array<i64: 48, 16>}, {pipeline_mode = #tpu.pipeline_mode<synchronous>, transform_indices = @transform_8, window_bounds = array<i64: 128, 128>}, {transform_indices = @transform_9, window_bounds = array<i64: 1, 128, 128>}, {transform_indices = @transform_10, window_bounds = array<i64: 1, 128, 128>}, {transform_indices = @transform_11, window_bounds = array<i64: 1, 128, 128>}, {transform_indices = @transform_12, window_bounds = array<i64: 1, 128, 128>}, {transform_indices = @transform_13, window_bounds = array<i64: 1, 128, 256>}, {transform_indices = @transform_14, window_bounds = array<i64: 1, 256, 128>}, {transform_indices = @transform_15, window_bounds = array<i64: 1, 128, 256>}, {transform_indices = @transform_16, window_bounds = array<i64: 1, 256, 128>}, {pipeline_mode = #tpu.pipeline_mode<synchronous>, transform_indices = @transform_17, window_bounds = array<i64: 16, 128>}]} {
    %c0_i32 = arith.constant 0 : i32
    %0 = arith.cmpi eq, %arg0, %c0_i32 : i32
    %1 = arith.extui %0 : i1 to i32
    %c0_i32_0 = arith.constant 0 : i32
    %2 = arith.cmpi ne, %1, %c0_i32_0 : i32
    scf.if %2 {
      %c0_60 = arith.constant 0 : index
      %c0_61 = arith.constant 0 : index
      %75 = vector.load %arg1[%c0_60, %c0_61] : memref<16x12xf32, #tpu.memory_space<vmem>>, vector<16x12xf32>
      %c0_62 = arith.constant 0 : index
      %c0_63 = arith.constant 0 : index
      %76 = vector.load %arg3[%c0_62, %c0_63] : memref<12x128xf32, #tpu.memory_space<vmem>>, vector<12x128xf32>
      %cst_64 = arith.constant dense<0.000000e+00> : vector<16x128xf32>
      %77 = tpu.matmul %75, %76, %cst_64 {dimension_numbers = #tpu.dot_dimension_numbers<[1], [0], [0], [1], [0, 0, 1, 1], [], []>} : vector<16x12xf32>, vector<12x128xf32>, vector<16x128xf32> -> vector<16x128xf32>
      %c0_65 = arith.constant 0 : index
      %c0_66 = arith.constant 0 : index
      %78 = vector.load %arg4[%c0_65, %c0_66] : memref<1x128xf32, #tpu.memory_space<vmem>>, vector<1x128xf32>
      %79 = vector.broadcast %78 : vector<1x128xf32> to vector<16x128xf32>
      %80 = arith.addf %77, %79 : vector<16x128xf32>
      %c0_67 = arith.constant 0 : index
      %c0_68 = arith.constant 0 : index
      %81 = vector.load %arg19[%c0_67, %c0_68] : memref<16x128xf32, #tpu.memory_space<vmem>>, vector<16x128xf32>
      tpu.vector_store %arg19[%c0_67, %c0_68], %80 {strides = array<i32>} : memref<16x128xf32, #tpu.memory_space<vmem>>, vector<16x128xf32>,
      %c0_69 = arith.constant 0 : index
      %c0_70 = arith.constant 0 : index
      %82 = vector.load %arg2[%c0_69, %c0_70] : memref<48x6xf32, #tpu.memory_space<vmem>>, vector<48x6xf32>
      %c0_71 = arith.constant 0 : index
      %c0_72 = arith.constant 0 : index
      %83 = vector.load %arg5[%c0_71, %c0_72] : memref<6x128xf32, #tpu.memory_space<vmem>>, vector<6x128xf32>
      %cst_73 = arith.constant dense<0.000000e+00> : vector<48x128xf32>
      %84 = tpu.matmul %82, %83, %cst_73 {dimension_numbers = #tpu.dot_dimension_numbers<[1], [0], [0], [1], [0, 0, 1, 1], [], []>} : vector<48x6xf32>, vector<6x128xf32>, vector<48x128xf32> -> vector<48x128xf32>
      %c0_74 = arith.constant 0 : index
      %c0_75 = arith.constant 0 : index
      %85 = vector.load %arg6[%c0_74, %c0_75] : memref<1x128xf32, #tpu.memory_space<vmem>>, vector<1x128xf32>
      %86 = vector.broadcast %85 : vector<1x128xf32> to vector<48x128xf32>
      %87 = arith.addf %84, %86 : vector<48x128xf32>
      %c0_76 = arith.constant 0 : index
      %c0_77 = arith.constant 0 : index
      %88 = vector.load %arg20[%c0_76, %c0_77] : memref<48x128xf32, #tpu.memory_space<vmem>>, vector<48x128xf32>
      tpu.vector_store %arg20[%c0_76, %c0_77], %87 {strides = array<i32>} : memref<48x128xf32, #tpu.memory_space<vmem>>, vector<48x128xf32>,
    } else {
    }
    %c0 = arith.constant 0 : index
    %c0_1 = arith.constant 0 : index
    %3 = vector.load %arg19[%c0, %c0_1] : memref<16x128xf32, #tpu.memory_space<vmem>>, vector<16x128xf32>
    %c0_2 = arith.constant 0 : index
    %c0_3 = arith.constant 0 : index
    %4 = vector.load %arg20[%c0_2, %c0_3] : memref<48x128xf32, #tpu.memory_space<vmem>>, vector<48x128xf32>
    %c0_4 = arith.constant 0 : index
    %c0_5 = arith.constant 0 : index
    %5 = vector.load %arg7[%c0_4, %c0_5] : memref<48x16xbf16, #tpu.memory_space<vmem>>, vector<48x16xbf16>
    %6 = arith.extf %5 : vector<48x16xbf16> to vector<48x16xf32>
    %c0_6 = arith.constant 0 : index
    %c0_7 = arith.constant 0 : index
    %7 = vector.load %arg8[%c0_6, %c0_7] : memref<48x16xbf16, #tpu.memory_space<vmem>>, vector<48x16xbf16>
    %8 = arith.extf %7 : vector<48x16xbf16> to vector<48x16xf32>
    %c0_8 = arith.constant 0 : index
    %c0_9 = arith.constant 0 : index
    %9 = vector.load %arg9[%c0_8, %c0_9] : memref<128x128xbf16, #tpu.memory_space<vmem>>, vector<128x128xbf16>
    %10 = arith.extf %9 : vector<128x128xbf16> to vector<128x128xf32>
    %c0_10 = arith.constant 0 : index
    %c0_11 = arith.constant 0 : index
    %c0_12 = arith.constant 0 : index
    %11 = vector.load %arg10[%c0_10, %c0_11, %c0_12] : memref<1x128x128xf32, #tpu.memory_space<vmem>>, vector<1x128x128xf32>
    %12 = vector.shape_cast %11 : vector<1x128x128xf32> to vector<128x128xf32>
    %cst = arith.constant dense<0.000000e+00> : vector<16x128xf32>
    %13 = tpu.matmul %3, %12, %cst {dimension_numbers = #tpu.dot_dimension_numbers<[1], [0], [0], [1], [0, 0, 1, 1], [], []>} : vector<16x128xf32>, vector<128x128xf32>, vector<16x128xf32> -> vector<16x128xf32>
    %c0_13 = arith.constant 0 : index
    %c0_14 = arith.constant 0 : index
    %c0_15 = arith.constant 0 : index
    %14 = vector.load %arg11[%c0_13, %c0_14, %c0_15] : memref<1x128x128xf32, #tpu.memory_space<vmem>>, vector<1x128x128xf32>
    %15 = vector.shape_cast %14 : vector<1x128x128xf32> to vector<128x128xf32>
    %cst_16 = arith.constant dense<0.000000e+00> : vector<16x128xf32>
    %16 = tpu.matmul %3, %15, %cst_16 {dimension_numbers = #tpu.dot_dimension_numbers<[1], [0], [0], [1], [0, 0, 1, 1], [], []>} : vector<16x128xf32>, vector<128x128xf32>, vector<16x128xf32> -> vector<16x128xf32>
    %c0_17 = arith.constant 0 : index
    %c0_18 = arith.constant 0 : index
    %c0_19 = arith.constant 0 : index
    %17 = vector.load %arg12[%c0_17, %c0_18, %c0_19] : memref<1x128x128xf32, #tpu.memory_space<vmem>>, vector<1x128x128xf32>
    %18 = vector.shape_cast %17 : vector<1x128x128xf32> to vector<128x128xf32>
    %cst_20 = arith.constant dense<0.000000e+00> : vector<16x128xf32>
    %19 = tpu.matmul %3, %18, %cst_20 {dimension_numbers = #tpu.dot_dimension_numbers<[1], [0], [0], [1], [0, 0, 1, 1], [], []>} : vector<16x128xf32>, vector<128x128xf32>, vector<16x128xf32> -> vector<16x128xf32>
    %c0_21 = arith.constant 0 : index
    %c0_22 = arith.constant 0 : index
    %c0_23 = arith.constant 0 : index
    %20 = vector.load %arg13[%c0_21, %c0_22, %c0_23] : memref<1x128x128xf32, #tpu.memory_space<vmem>>, vector<1x128x128xf32>
    %21 = vector.shape_cast %20 : vector<1x128x128xf32> to vector<128x128xf32>
    %cst_24 = arith.constant dense<0.000000e+00> : vector<48x128xf32>
    %22 = tpu.matmul %4, %21, %cst_24 {dimension_numbers = #tpu.dot_dimension_numbers<[1], [0], [0], [1], [0, 0, 1, 1], [], []>} : vector<48x128xf32>, vector<128x128xf32>, vector<48x128xf32> -> vector<48x128xf32>
    %cst_25 = arith.constant dense<0.000000e+00> : vector<48x128xf32>
    %23 = tpu.matmul %6, %16, %cst_25 {dimension_numbers = #tpu.dot_dimension_numbers<[1], [0], [0], [1], [0, 0, 1, 1], [], []>} : vector<48x16xf32>, vector<16x128xf32>, vector<48x128xf32> -> vector<48x128xf32>
    %cst_26 = arith.constant dense<0.000000e+00> : vector<48x128xf32>
    %24 = tpu.matmul %8, %13, %cst_26 {dimension_numbers = #tpu.dot_dimension_numbers<[1], [0], [0], [1], [0, 0, 1, 1], [], []>} : vector<48x16xf32>, vector<16x128xf32>, vector<48x128xf32> -> vector<48x128xf32>
    %cst_27 = arith.constant dense<0.000000e+00> : vector<48x128xf32>
    %25 = tpu.matmul %6, %19, %cst_27 {dimension_numbers = #tpu.dot_dimension_numbers<[1], [0], [0], [1], [0, 0, 1, 1], [], []>} : vector<48x16xf32>, vector<16x128xf32>, vector<48x128xf32> -> vector<48x128xf32>
    %26 = arith.mulf %23, %24 : vector<48x128xf32>
    %cst_28 = arith.constant 0.176776692 : f32
    %27 = vector.broadcast %cst_28 : f32 to vector<48x128xf32>
    %28 = arith.mulf %26, %27 : vector<48x128xf32>
    %cst_29 = arith.constant -5.000000e+00 : f32
    %cst_30 = arith.constant 5.000000e+00 : f32
    %29 = vector.broadcast %cst_29 : f32 to vector<48x128xf32>
    %30 = arith.maximumf %29, %28 : vector<48x128xf32>
    %31 = vector.broadcast %cst_30 : f32 to vector<48x128xf32>
    %32 = arith.minimumf %31, %30 : vector<48x128xf32>
    %33 = arith.mulf %32, %22 : vector<48x128xf32>
    %cst_31 = arith.constant dense<0.000000e+00> : vector<48x128xf32>
    %34 = tpu.matmul %33, %10, %cst_31 {dimension_numbers = #tpu.dot_dimension_numbers<[1], [0], [0], [1], [0, 0, 1, 1], [], []>} : vector<48x128xf32>, vector<128x128xf32>, vector<48x128xf32> -> vector<48x128xf32>
    %cst_32 = arith.constant -5.000000e+00 : f32
    %cst_33 = arith.constant 5.000000e+00 : f32
    %35 = vector.broadcast %cst_32 : f32 to vector<48x128xf32>
    %36 = arith.maximumf %35, %34 : vector<48x128xf32>
    %37 = vector.broadcast %cst_33 : f32 to vector<48x128xf32>
    %38 = arith.minimumf %37, %36 : vector<48x128xf32>
    %39 = math.exp %38 : vector<48x128xf32>
    %40 = arith.mulf %25, %39 : vector<48x128xf32>
    %cst_34 = arith.constant dense<0.000000e+00> : vector<16x128xf32>
    %41 = tpu.matmul %8, %40, %cst_34 {dimension_numbers = #tpu.dot_dimension_numbers<[0], [0], [1], [1], [0, 1, 1, 1], [], []>} : vector<48x16xf32>, vector<48x128xf32>, vector<16x128xf32> -> vector<16x128xf32>
    %cst_35 = arith.constant dense<0.000000e+00> : vector<16x128xf32>
    %42 = tpu.matmul %8, %39, %cst_35 {dimension_numbers = #tpu.dot_dimension_numbers<[0], [0], [1], [1], [0, 1, 1, 1], [], []>} : vector<48x16xf32>, vector<48x128xf32>, vector<16x128xf32> -> vector<16x128xf32>
    %cst_36 = arith.constant 9.99999997E-7 : f32
    %43 = vector.broadcast %cst_36 : f32 to vector<16x128xf32>
    %44 = arith.addf %42, %43 : vector<16x128xf32>
    %45 = arith.divf %41, %44 : vector<16x128xf32>
    %c0_37 = arith.constant 0 : index
    %c0_38 = arith.constant 0 : index
    %c0_39 = arith.constant 0 : index
    %46 = vector.load %arg14[%c0_37, %c0_38, %c0_39] : memref<1x128x256xf32, #tpu.memory_space<vmem>>, vector<1x128x256xf32>
    %47 = vector.shape_cast %46 : vector<1x128x256xf32> to vector<128x256xf32>
    %cst_40 = arith.constant dense<0.000000e+00> : vector<16x256xf32>
    %48 = tpu.matmul %45, %47, %cst_40 {dimension_numbers = #tpu.dot_dimension_numbers<[1], [0], [0], [1], [0, 0, 1, 1], [], []>} : vector<16x128xf32>, vector<128x256xf32>, vector<16x256xf32> -> vector<16x256xf32>
    %49 = arith.negf %48 : vector<16x256xf32>
    %50 = math.exp %49 : vector<16x256xf32>
    %cst_41 = arith.constant 1.000000e+00 : f32
    %51 = vector.broadcast %cst_41 : f32 to vector<16x256xf32>
    %52 = arith.addf %51, %50 : vector<16x256xf32>
    %53 = arith.divf %51, %52 : vector<16x256xf32>
    %54 = arith.mulf %48, %53 : vector<16x256xf32>
    %c0_42 = arith.constant 0 : index
    %c0_43 = arith.constant 0 : index
    %c0_44 = arith.constant 0 : index
    %55 = vector.load %arg15[%c0_42, %c0_43, %c0_44] : memref<1x256x128xf32, #tpu.memory_space<vmem>>, vector<1x256x128xf32>
    %56 = vector.shape_cast %55 : vector<1x256x128xf32> to vector<256x128xf32>
    %cst_45 = arith.constant dense<0.000000e+00> : vector<16x128xf32>
    %57 = tpu.matmul %54, %56, %cst_45 {dimension_numbers = #tpu.dot_dimension_numbers<[1], [0], [0], [1], [0, 0, 1, 1], [], []>} : vector<16x256xf32>, vector<256x128xf32>, vector<16x128xf32> -> vector<16x128xf32>
    %c0_46 = arith.constant 0 : index
    %c0_47 = arith.constant 0 : index
    %58 = vector.load %arg19[%c0_46, %c0_47] : memref<16x128xf32, #tpu.memory_space<vmem>>, vector<16x128xf32>
    tpu.vector_store %arg19[%c0_46, %c0_47], %57 {strides = array<i32>} : memref<16x128xf32, #tpu.memory_space<vmem>>, vector<16x128xf32>,
    %c0_48 = arith.constant 0 : index
    %c0_49 = arith.constant 0 : index
    %c0_50 = arith.constant 0 : index
    %59 = vector.load %arg16[%c0_48, %c0_49, %c0_50] : memref<1x128x256xf32, #tpu.memory_space<vmem>>, vector<1x128x256xf32>
    %60 = vector.shape_cast %59 : vector<1x128x256xf32> to vector<128x256xf32>
    %cst_51 = arith.constant dense<0.000000e+00> : vector<48x256xf32>
    %61 = tpu.matmul %33, %60, %cst_51 {dimension_numbers = #tpu.dot_dimension_numbers<[1], [0], [0], [1], [0, 0, 1, 1], [], []>} : vector<48x128xf32>, vector<128x256xf32>, vector<48x256xf32> -> vector<48x256xf32>
    %62 = arith.negf %61 : vector<48x256xf32>
    %63 = math.exp %62 : vector<48x256xf32>
    %cst_52 = arith.constant 1.000000e+00 : f32
    %64 = vector.broadcast %cst_52 : f32 to vector<48x256xf32>
    %65 = arith.addf %64, %63 : vector<48x256xf32>
    %66 = arith.divf %64, %65 : vector<48x256xf32>
    %67 = arith.mulf %61, %66 : vector<48x256xf32>
    %c0_53 = arith.constant 0 : index
    %c0_54 = arith.constant 0 : index
    %c0_55 = arith.constant 0 : index
    %68 = vector.load %arg17[%c0_53, %c0_54, %c0_55] : memref<1x256x128xf32, #tpu.memory_space<vmem>>, vector<1x256x128xf32>
    %69 = vector.shape_cast %68 : vector<1x256x128xf32> to vector<256x128xf32>
    %cst_56 = arith.constant dense<0.000000e+00> : vector<48x128xf32>
    %70 = tpu.matmul %67, %69, %cst_56 {dimension_numbers = #tpu.dot_dimension_numbers<[1], [0], [0], [1], [0, 0, 1, 1], [], []>} : vector<48x256xf32>, vector<256x128xf32>, vector<48x128xf32> -> vector<48x128xf32>
    %c0_57 = arith.constant 0 : index
    %c0_58 = arith.constant 0 : index
    %71 = vector.load %arg20[%c0_57, %c0_58] : memref<48x128xf32, #tpu.memory_space<vmem>>, vector<48x128xf32>
    tpu.vector_store %arg20[%c0_57, %c0_58], %70 {strides = array<i32>} : memref<48x128xf32, #tpu.memory_space<vmem>>, vector<48x128xf32>,
    %c2_i32 = arith.constant 2 : i32
    %72 = arith.cmpi eq, %arg0, %c2_i32 : i32
    %73 = arith.extui %72 : i1 to i32
    %c0_i32_59 = arith.constant 0 : i32
    %74 = arith.cmpi ne, %73, %c0_i32_59 : i32
    scf.if %74 {
      %c0_60 = arith.constant 0 : index
      %c0_61 = arith.constant 0 : index
      %75 = vector.load %arg19[%c0_60, %c0_61] : memref<16x128xf32, #tpu.memory_space<vmem>>, vector<16x128xf32>
      %c0_62 = arith.constant 0 : index
      %c0_63 = arith.constant 0 : index
      %76 = vector.load %arg18[%c0_62, %c0_63] : memref<16x128xf32, #tpu.memory_space<vmem>>, vector<16x128xf32>
      tpu.vector_store %arg18[%c0_62, %c0_63], %75 {strides = array<i32>} : memref<16x128xf32, #tpu.memory_space<vmem>>, vector<16x128xf32>,
    } else {
    }
    return
  }
  func.func @transform_0(%arg0: i32) -> (i32, i32) {
    %c0_i32 = arith.constant 0 : i32
    %c0_i32_0 = arith.constant 0 : i32
    %c0_i32_1 = arith.constant 0 : i32
    return %c0_i32, %c0_i32_0 : i32, i32
  }
  func.func @transform_1(%arg0: i32) -> (i32, i32) {
    %c0_i32 = arith.constant 0 : i32
    %c0_i32_0 = arith.constant 0 : i32
    %c0_i32_1 = arith.constant 0 : i32
    return %c0_i32, %c0_i32_0 : i32, i32
  }
  func.func @transform_2(%arg0: i32) -> (i32, i32) {
    %c0_i32 = arith.constant 0 : i32
    %c0_i32_0 = arith.constant 0 : i32
    %c0_i32_1 = arith.constant 0 : i32
    return %c0_i32, %c0_i32_0 : i32, i32
  }
  func.func @transform_3(%arg0: i32) -> (i32, i32) {
    %c0_i32 = arith.constant 0 : i32
    %c0_i32_0 = arith.constant 0 : i32
    %c0_i32_1 = arith.constant 0 : i32
    return %c0_i32, %c0_i32_0 : i32, i32
  }
  func.func @transform_4(%arg0: i32) -> (i32, i32) {
    %c0_i32 = arith.constant 0 : i32
    %c0_i32_0 = arith.constant 0 : i32
    %c0_i32_1 = arith.constant 0 : i32
    return %c0_i32, %c0_i32_0 : i32, i32
  }
  func.func @transform_5(%arg0: i32) -> (i32, i32) {
    %c0_i32 = arith.constant 0 : i32
    %c0_i32_0 = arith.constant 0 : i32
    %c0_i32_1 = arith.constant 0 : i32
    return %c0_i32, %c0_i32_0 : i32, i32
  }
  func.func @transform_6(%arg0: i32) -> (i32, i32) {
    %c0_i32 = arith.constant 0 : i32
    %c0_i32_0 = arith.constant 0 : i32
    %c0_i32_1 = arith.constant 0 : i32
    return %c0_i32, %c0_i32_0 : i32, i32
  }
  func.func @transform_7(%arg0: i32) -> (i32, i32) {
    %c0_i32 = arith.constant 0 : i32
    %c0_i32_0 = arith.constant 0 : i32
    %c0_i32_1 = arith.constant 0 : i32
    return %c0_i32, %c0_i32_0 : i32, i32
  }
  func.func @transform_8(%arg0: i32) -> (i32, i32) {
    %c0_i32 = arith.constant 0 : i32
    %c0_i32_0 = arith.constant 0 : i32
    %c0_i32_1 = arith.constant 0 : i32
    return %c0_i32, %c0_i32_0 : i32, i32
  }
  func.func @transform_9(%arg0: i32) -> (i32, i32, i32) {
    %c0_i32 = arith.constant 0 : i32
    %c0_i32_0 = arith.constant 0 : i32
    %c0_i32_1 = arith.constant 0 : i32
    return %arg0, %c0_i32, %c0_i32_0 : i32, i32, i32
  }
  func.func @transform_10(%arg0: i32) -> (i32, i32, i32) {
    %c0_i32 = arith.constant 0 : i32
    %c0_i32_0 = arith.constant 0 : i32
    %c0_i32_1 = arith.constant 0 : i32
    return %arg0, %c0_i32, %c0_i32_0 : i32, i32, i32
  }
  func.func @transform_11(%arg0: i32) -> (i32, i32, i32) {
    %c0_i32 = arith.constant 0 : i32
    %c0_i32_0 = arith.constant 0 : i32
    %c0_i32_1 = arith.constant 0 : i32
    return %arg0, %c0_i32, %c0_i32_0 : i32, i32, i32
  }
  func.func @transform_12(%arg0: i32) -> (i32, i32, i32) {
    %c0_i32 = arith.constant 0 : i32
    %c0_i32_0 = arith.constant 0 : i32
    %c0_i32_1 = arith.constant 0 : i32
    return %arg0, %c0_i32, %c0_i32_0 : i32, i32, i32
  }
  func.func @transform_13(%arg0: i32) -> (i32, i32, i32) {
    %c0_i32 = arith.constant 0 : i32
    %c0_i32_0 = arith.constant 0 : i32
    %c0_i32_1 = arith.constant 0 : i32
    return %arg0, %c0_i32, %c0_i32_0 : i32, i32, i32
  }
  func.func @transform_14(%arg0: i32) -> (i32, i32, i32) {
    %c0_i32 = arith.constant 0 : i32
    %c0_i32_0 = arith.constant 0 : i32
    %c0_i32_1 = arith.constant 0 : i32
    return %arg0, %c0_i32, %c0_i32_0 : i32, i32, i32
  }
  func.func @transform_15(%arg0: i32) -> (i32, i32, i32) {
    %c0_i32 = arith.constant 0 : i32
    %c0_i32_0 = arith.constant 0 : i32
    %c0_i32_1 = arith.constant 0 : i32
    return %arg0, %c0_i32, %c0_i32_0 : i32, i32, i32
  }
  func.func @transform_16(%arg0: i32) -> (i32, i32, i32) {
    %c0_i32 = arith.constant 0 : i32
    %c0_i32_0 = arith.constant 0 : i32
    %c0_i32_1 = arith.constant 0 : i32
    return %arg0, %c0_i32, %c0_i32_0 : i32, i32, i32
  }
  func.func @transform_17(%arg0: i32) -> (i32, i32) {
    %c0_i32 = arith.constant 0 : i32
    %c0_i32_0 = arith.constant 0 : i32
    %c0_i32_1 = arith.constant 0 : i32
    return %c0_i32, %c0_i32_0 : i32, i32
  }
}

</mosaic_0001>

<bundles_post_ra>
// kernel: tpu_custom_call.1
= control target key start
LH: loop header
LB: loop body
LE: loop exit
PB: predicated region body
PF: predicated region fallthrough
CT: control target
= control target key end

     0   :  { %s5454_s0 = inlined_call_operand.vmem [shape: f32[16,12], index: 0, kind: input, shape index: {}]   ;;  %s5455_s1 = inlined_call_operand.vmem [shape: f32[48,6], index: 1, kind: input, shape index: {}]   ;;  %s5456_s2 = inlined_call_operand.vmem [shape: f32[12,128], index: 2, kind: input, shape index: {}]   ;;  %s5457_s3 = inlined_call_operand.vmem [shape: f32[1,128], index: 3, kind: input, shape index: {}]   ;;  %s5458_s4 = inlined_call_operand.vmem [shape: f32[6,128], index: 4, kind: input, shape index: {}]   ;;  %s5459_s5 = inlined_call_operand.vmem [shape: f32[1,128], index: 5, kind: input, shape index: {}]   ;;  %s5460_s6 = inlined_call_operand.vmem [shape: bf16[48,16], index: 6, kind: input, shape index: {}]   ;;  %s5461_s7 = inlined_call_operand.vmem [shape: bf16[48,16], index: 7, kind: input, shape index: {}]   ;;  %s5462_s8 = inlined_call_operand.vmem [shape: bf16[128,128], index: 8, kind: input, shape index: {}]   ;;  %s5463_s9 = inlined_call_operand.hbm [shape: f32[3,128,128], index: 9, kind: input, shape index: {}]   ;;  %s5464_s10 = inlined_call_operand.hbm [shape: f32[3,128,128], index: 10, kind: input, shape index: {}]   ;;  %s5465_s11 = inlined_call_operand.hbm [shape: f32[3,128,128], index: 11, kind: input, shape index: {}]   ;;  %s5466_s12 = inlined_call_operand.hbm [shape: f32[3,128,128], index: 12, kind: input, shape index: {}]   ;;  %s5467_s13 = inlined_call_operand.hbm [shape: f32[3,128,256], index: 13, kind: input, shape index: {}]   ;;  %s5468_s14 = inlined_call_operand.hbm [shape: f32[3,256,128], index: 14, kind: input, shape index: {}]   ;;  %s5469_s15 = inlined_call_operand.hbm [shape: f32[3,128,256], index: 15, kind: input, shape index: {}]   ;;  %s5470_s16 = inlined_call_operand.hbm [shape: f32[3,256,128], index: 16, kind: input, shape index: {}]   ;;  %s5471_s17 = inlined_call_operand.hbm [shape: f32[16,128], index: 17, kind: output, shape index: {}]  }
   0x1   :  { %5492 = sst [smem:[#allocation29_spill]] %s5454_s0 }
   0x2   :  { %5493 = sst [smem:[#allocation30_spill]] %s5455_s1 }
   0x3   :  { %5494 = sst [smem:[#allocation31_spill]] %s5456_s2 }
   0x4   :  { %5495 = sst [smem:[#allocation32_spill]] %s5457_s3 }
   0x5   :  { %5496 = sst [smem:[#allocation33_spill]] %s5458_s4 }
   0x6   :  { %5497 = sst [smem:[#allocation34_spill]] %s5459_s5 }
   0x7   :  { %5498 = sst [smem:[#allocation35_spill]] %s5460_s6 }
   0x8   :  { %5499 = sst [smem:[#allocation36_spill]] %s5461_s7 }
   0x9   :  { %5500 = sst [smem:[#allocation37_spill]] %s5462_s8 }
   0xa   :  { %5501 = sst [smem:[#allocation38_spill]] %s5464_s10 }
   0xb   :  { %5502 = sst [smem:[#allocation39_spill]] %s5466_s12 }
   0xc   :  { %5503 = sst [smem:[#allocation40_spill]] %s5468_s14 }
   0xd   :  { %5504 = sst [smem:[#allocation41_spill]] %s5471_s17 }
   0xe   :  { %22 = vsyncpa [#allocation5], 0 }
   0xf   :  { %24 = vsyncpa [#allocation5 + $0x1], 0 }
  0x10   :  { %25 = vsyncpa [#allocation8], 0 }
  0x11   :  { %27 = vsyncpa [#allocation8 + $0x1], 0 }
  0x12   :  { %28 = vsyncpa [#allocation11], 0 }
  0x13   :  { %30 = vsyncpa [#allocation11 + $0x1], 0 }
  0x14   :  { %31 = vsyncpa [#allocation14], 0 }
  0x15   :  { %33 = vsyncpa [#allocation14 + $0x1], 0 }
  0x16   :  { %34 = vsyncpa [#allocation17], 0 }
  0x17   :  { %36 = vsyncpa [#allocation17 + $0x1], 0 }
  0x18   :  { %37 = vsyncpa [#allocation6], 0  ;;  %s4618_s24 = smov 0   ;;  %s4620_s25 = smov 0  }
  0x19   :  { %s4622_s26 = smov 0   ;;  %s4624_s27 = smov 0  }
  0x1a LB: > { %5505 = sst [smem:[#allocation25_spill]] %s4505_s26  ;;  %s4637_s28 = sadd.s32 4294967295, %s4509_s27   ;;  %s4509_s27 = sphi %s4624_s27, %s5541_s27   ;;  %s4505_s26 = sphi %s4622_s26, %s5543_s26   ;;  %s4501_s25 = sphi %s4620_s25, %s5545_s25   ;;  %s4497_s24 = sphi %s4618_s24, %s5544_s24  }
  0x1b   : > { %5506 = sst [smem:[#allocation26_spill]] %s4637_s28  ;;  %s4640_s29 = sadd.s32 1, %s4509_s27  }
  0x1c   : > { %5507 = sst [smem:[#allocation27_spill]] %s4640_s29  ;;  %s236_s0 = ssub.s32 %s4509_s27, %s4640_s29 }
  0x1d   : > { %s239_s30 = sadd.s32 1, %s4505_s26  ;;  %p237_p0 = scmp.eq.s32.totalorder %s236_s0, 0 }
  0x1e   : > { %p246_p1 = scmp.ne.s32.totalorder %s4505_s26, %s4501_s25  ;;  %p247_p2 = scmp.eq.s32.totalorder %s4509_s27, 0 }
  0x1f   : > { %p252_p3 = scmp.ne.s32.totalorder %s4501_s25, %s4497_s24  ;;  %p253_p5 = scmp.eq.s32.totalorder %s4637_s28, 0 }
  0x20   : > { %s4650_s18 = scalar_select %p237_p0, %s4505_s26, %s239_s30  }
  0x21   : > { %p248_p4 = por %p247_p2, %p246_p1  ;;  %p4065_p6 = scmp.lt.s32.totalorder %s4509_s27, 3 }
  0x22   : > { %5508 = sst [smem:[#allocation28_spill]] %s4650_s18  ;;  %p4654_p7 = por %p253_p5, %p252_p3 }
  0x23   : > { %s4659_s1 = sand.u32 1, %s4505_s26   ;;  %s4665_s21 = sshll.u32 %s4509_s27, 11 }
  0x24   : > { %s5509_s19 = scalar_select %p4654_p7, 1, 0 }
  0x25   : > { %s4662_s20 = sshll.u32 %s4659_s1, 7  ;;  %p4667_p8 = pnand %p4065_p6, %p248_p4 }
  0x26   : > { %s4672_s23 = sand.u32 1, %s4509_s27   ;;  %s5511_s10 = sld [smem:[#allocation38_spill]] }
  0x27   : > { %s531_s18 = scalar_lea.vmem [#allocation7], %s4662_s20  ;;  %p4690_p12 = pneg %p4667_p8 }
  0x28   : > { %s538_s26 = sshll.u32 %s531_s18, 4  ;;  %s4682_s26 = int_to_ptr.vmem [resolvable:$true] %s538_s26 }
  0x2c   : > { %s4678_s30 = scalar_lea.hbm %s5511_s10, %s4665_s21  ;;  %s4194_s18 = scalar_lea.hbm %s5511_s10, 6144 }
  0x2d   : > { %s4189_s17 = scalar_lea.hbm %s4678_s30, 2048  ;;  %p4195_p1 = scmp.lt.u32.totalorder %s4678_s30, %s5511_s10 }
  0x2e   : > { %p4190_p11 = scmp.ne.s32.totalorder %s4678_s30, %s4189_s17  ;;  %p4196_p2 = scmp.lt.u32.totalorder %s4194_s18, %s4189_s17 }
  0x2f   : > { %p4198_p4 = scmp.lt.u32.totalorder %s4189_s17, %s4678_s30 }
  0x30   : > { %p4192_p13 = pnand %p4690_p12, %p4190_p11  ;;  %p4197_p3 = por %p4196_p2, %p4195_p1 }
  0x32   : > { %p4193_p0 = pneg %p4192_p13  ;;  %p4199_p5 = por %p4198_p4, %p4197_p3 }
  0x34   : > { %p4200_p6 = pnand %p4199_p5, %p4193_p0 }
  0x36   : > { %4203 = shalt.err (!%p4200_p6)
}
  0x37   : > { %s4204_s29 = scalar_lea.vmem %s4682_s26, 2048  ;;  %s4511_s24 = smov [#allocation7]  }
  0x38   : > { %p4205_p11 = scmp.ne.s32.totalorder %s4682_s26, %s4204_s29  ;;  %s4209_s0 = sshll.u32 %s4511_s24, 4  ;;  %s4210_s0 = int_to_ptr.vmem [resolvable:$false] %s4209_s0 }
  0x39   : > { %s4211_s6 = scalar_lea.vmem %s4210_s0, 4096  ;;  %p4212_p10 = scmp.lt.s32.totalorder %s4682_s26, %s4210_s0 }
  0x3a   : > { %p4207_p13 = pnand %p4205_p11, %p4690_p12  ;;  %p4213_p7 = scmp.lt.s32.totalorder %s4211_s6, %s4204_s29 }
  0x3c   : > { %p4208_p9 = pneg %p4207_p13  ;;  %p4214_p1 = por %p4213_p7, %p4212_p10 }
  0x3e   : > { %p4215_p2 = pnand %p4214_p1, %p4208_p9 }
  0x40   : > { %4218 = shalt.err (!%p4215_p2)
}
  0x41   : > { %s5482_s7 = smov 128   ;;  %s5484_s17 = smov 8  }
  0x42   : > { %s5513_s29 = scalar_lea.sflag [#allocation8], %s4672_s23  ;;  %p5514_p7 = scmp.lt.s32.totalorder %s4509_s27, 4 }
  0x43   : > { %4046 = dma.hbm_to_vmem [thread:$0]  (!%p4667_p8), %s4678_s30, 2048, %s4682_s26, %s5513_s29, %s5482_s7, %s5482_s7, %s5484_s17  }
  0x44   : > { %p5515_p9 = scmp.ge.s32.totalorder %s4509_s27, 1  ;;  %s5517_s12 = sld [smem:[#allocation39_spill]] }
  0x45   : > { %s573_s10 = scalar_lea.vmem [#allocation10], %s4662_s20  ;;  %s4734_s5 = sshll.u32 %s4659_s1, 8 }
  0x46   : > { %p4722_p10 = pnand %p5515_p9, %p5514_p7  ;;  %s580_s3 = sshll.u32 %s573_s10, 4  ;;  %s4736_s3 = int_to_ptr.vmem [resolvable:$true] %s580_s3 }
  0x47   : > { %s4739_s26 = sshll.u32 %s4509_s27, 12  ;;  %s5487_s30 = scalar_lea.sflag [#allocation11], %s4672_s23 }
  0x48   : > { %s5516_s18 = scalar_select %p4722_p10, 1, 0 }
  0x4a   : > { %s4730_s6 = scalar_lea.hbm %s5517_s12, %s4665_s21  ;;  %s4224_s7 = scalar_lea.hbm %s5517_s12, 6144 }
  0x4b   : > { %s4219_s29 = scalar_lea.hbm %s4730_s6, 2048  ;;  %p4225_p5 = scmp.lt.u32.totalorder %s4730_s6, %s5517_s12 }
  0x4c   : > { %p4220_p0 = scmp.ne.s32.totalorder %s4730_s6, %s4219_s29  ;;  %p4226_p6 = scmp.lt.u32.totalorder %s4224_s7, %s4219_s29 }
  0x4d   : > { %p4228_p13 = scmp.lt.u32.totalorder %s4219_s29, %s4730_s6 }
  0x4e   : > { %p4222_p3 = pnand %p4220_p0, %p4690_p12  ;;  %p4227_p11 = por %p4226_p6, %p4225_p5 }
  0x50   : > { %p4223_p4 = pneg %p4222_p3  ;;  %p4229_p1 = por %p4228_p13, %p4227_p11 }
  0x52   : > { %p4230_p2 = pnand %p4229_p1, %p4223_p4 }
  0x54   : > { %4233 = shalt.err (!%p4230_p2)
}
  0x55   : > { %s4234_s10 = scalar_lea.vmem %s4736_s3, 2048  ;;  %s4514_s27 = smov [#allocation10]  }
  0x56   : > { %p4235_p7 = scmp.ne.s32.totalorder %s4736_s3, %s4234_s10  ;;  %s4239_s24 = sshll.u32 %s4514_s27, 4  ;;  %s4240_s24 = int_to_ptr.vmem [resolvable:$false] %s4239_s24 }
  0x57   : > { %s4241_s2 = scalar_lea.vmem %s4240_s24, 4096  ;;  %p4242_p3 = scmp.lt.s32.totalorder %s4736_s3, %s4240_s24 }
  0x58   : > { %p4237_p9 = pnand %p4235_p7, %p4690_p12  ;;  %p4243_p10 = scmp.lt.s32.totalorder %s4241_s2, %s4234_s10 }
  0x5a   : > { %p4238_p0 = pneg %p4237_p9  ;;  %p4244_p5 = por %p4243_p10, %p4242_p3 }
  0x5c   : > { %p4245_p6 = pnand %p4244_p5, %p4238_p0 }
  0x5e   : > { %4248 = shalt.err (!%p4245_p6)
}
  0x5f   : > { %s5518_s7 = smov 8   ;;  %s5519_s17 = smov 128  }
  0x60   : > { %4052 = dma.hbm_to_vmem [thread:$0]  (!%p4667_p8), %s4730_s6, 2048, %s4736_s3, %s5487_s30, %s5519_s17, %s5519_s17, %s5518_s7  }
  0x61   : > { %s5520_s14 = sld [smem:[#allocation40_spill]]  ;;  %s615_s27 = scalar_lea.vmem [#allocation13], %s4734_s5 }
  0x62   : > { %s622_s24 = sshll.u32 %s615_s27, 4  ;;  %s5488_s2 = scalar_lea.sflag [#allocation14], %s4672_s23  ;;  %s4775_s24 = int_to_ptr.vmem [resolvable:$true] %s622_s24 }
  0x67   : > { %s4772_s10 = scalar_lea.hbm %s5520_s14, %s4739_s26  ;;  %s4254_s29 = scalar_lea.hbm %s5520_s14, 12288 }
  0x68   : > { %s4249_s12 = scalar_lea.hbm %s4772_s10, 4096  ;;  %p4255_p13 = scmp.lt.u32.totalorder %s4772_s10, %s5520_s14 }
  0x69   : > { %p4250_p10 = scmp.ne.s32.totalorder %s4772_s10, %s4249_s12  ;;  %p4256_p1 = scmp.lt.u32.totalorder %s4254_s29, %s4249_s12 }
  0x6a   : > { %p4258_p7 = scmp.lt.u32.totalorder %s4249_s12, %s4772_s10 }
  0x6b   : > { %p4252_p4 = pnand %p4250_p10, %p4690_p12  ;;  %p4257_p2 = por %p4256_p1, %p4255_p13 }
  0x6d   : > { %p4253_p11 = pneg %p4252_p4  ;;  %p4259_p9 = por %p4258_p7, %p4257_p2 }
  0x6f   : > { %p4260_p0 = pnand %p4259_p9, %p4253_p11 }
  0x71   : > { %4263 = shalt.err (!%p4260_p0)
}
  0x72   : > { %s4264_s27 = scalar_lea.vmem %s4775_s24, 4096  ;;  %s4515_s3 = smov [#allocation13]  }
  0x73   : > { %p4265_p3 = scmp.ne.s32.totalorder %s4775_s24, %s4264_s27  ;;  %s4269_s6 = sshll.u32 %s4515_s3, 4  ;;  %s4270_s6 = int_to_ptr.vmem [resolvable:$false] %s4269_s6 }
  0x74   : > { %s4271_s30 = scalar_lea.vmem %s4270_s6, 8192  ;;  %p4272_p10 = scmp.lt.s32.totalorder %s4775_s24, %s4270_s6 }
  0x75   : > { %p4267_p5 = pnand %p4265_p3, %p4690_p12  ;;  %p4273_p4 = scmp.lt.s32.totalorder %s4271_s30, %s4264_s27 }
  0x77   : > { %p4268_p6 = pneg %p4267_p5  ;;  %p4274_p13 = por %p4273_p4, %p4272_p10 }
  0x79   : > { %p4275_p1 = pnand %p4274_p13, %p4268_p6 }
  0x7b   : > { %4278 = shalt.err (!%p4275_p1)
}
  0x7c   : > { %4058 = dma.hbm_to_vmem [thread:$0]  (!%p4667_p8), %s4772_s10, 4096, %s4775_s24, %s5488_s2, %s5519_s17, %s5519_s17, %s5518_s7  }
  0x7d   : > { %s4808_s0 = scalar_lea.hbm %s5463_s9, %s4665_s21  ;;  %s510_s27 = scalar_lea.vmem [#allocation4], %s4662_s20 }
  0x7e   : > { %s517_s3 = sshll.u32 %s510_s27, 4  ;;  %s4817_s14 = scalar_lea.hbm %s5465_s11, %s4665_s21  ;;  %s4811_s3 = int_to_ptr.vmem [resolvable:$true] %s517_s3 }
  0x7f   : > { %s507_s4 = scalar_lea.sflag [#allocation5], %s4659_s1  ;;  %s4279_s10 = scalar_lea.hbm %s4808_s0, 2048 }
  0x80   : > { %p4280_p11 = scmp.ne.s32.totalorder %s4808_s0, %s4279_s10  ;;  %s4284_s29 = scalar_lea.hbm %s5463_s9, 6144 }
  0x81   : > { %p4285_p9 = scmp.lt.u32.totalorder %s4808_s0, %s5463_s9  ;;  %p4286_p0 = scmp.lt.u32.totalorder %s4284_s29, %s4279_s10 }
  0x82   : > { %p4282_p2 = pnand %p4280_p11, %p4690_p12  ;;  %p4288_p5 = scmp.lt.u32.totalorder %s4279_s10, %s4808_s0 }
  0x83   : > { %p4287_p3 = por %p4286_p0, %p4285_p9 }
  0x84   : > { %p4283_p7 = pneg %p4282_p2 }
  0x85   : > { %p4289_p6 = por %p4288_p5, %p4287_p3 }
  0x87   : > { %p4290_p10 = pnand %p4289_p6, %p4283_p7 }
  0x89   : > { %4293 = shalt.err (!%p4290_p10)
}
  0x8a   : > { %s4294_s21 = scalar_lea.vmem %s4811_s3, 2048  ;;  %s4516_s27 = smov [#allocation4]  }
  0x8b   : > { %p4295_p4 = scmp.ne.s32.totalorder %s4811_s3, %s4294_s21  ;;  %s4299_s6 = sshll.u32 %s4516_s27, 4  ;;  %s4300_s6 = int_to_ptr.vmem [resolvable:$false] %s4299_s6 }
  0x8c   : > { %s4301_s28 = scalar_lea.vmem %s4300_s6, 4096  ;;  %p4302_p11 = scmp.lt.s32.totalorder %s4811_s3, %s4300_s6 }
  0x8d   : > { %p4297_p13 = pnand %p4295_p4, %p4690_p12  ;;  %p4303_p2 = scmp.lt.s32.totalorder %s4301_s28, %s4294_s21 }
  0x8f   : > { %p4298_p1 = pneg %p4297_p13  ;;  %p4304_p9 = por %p4303_p2, %p4302_p11 }
  0x91   : > { %p4305_p0 = pnand %p4304_p9, %p4298_p1 }
  0x93   : > { %4308 = shalt.err (!%p4305_p0)
}
  0x94   : > { %4043 = dma.hbm_to_vmem [thread:$0]  (!%p4667_p8), %s4808_s0, 2048, %s4811_s3, %s507_s4, %s5519_s17, %s5519_s17, %s5518_s7  }
  0x95   : > { %s552_s2 = scalar_lea.vmem [#allocation9], %s4662_s20  ;;  %s4853_s12 = scalar_lea.hbm %s5467_s13, %s4739_s26 }
  0x96   : > { %s559_s30 = sshll.u32 %s552_s2, 4  ;;  %s4309_s29 = scalar_lea.hbm %s4817_s14, 2048  ;;  %s4847_s30 = int_to_ptr.vmem [resolvable:$true] %s559_s30 }
  0x97   : > { %p4310_p7 = scmp.ne.s32.totalorder %s4817_s14, %s4309_s29  ;;  %s4314_s6 = scalar_lea.hbm %s5465_s11, 6144 }
  0x98   : > { %p4315_p6 = scmp.lt.u32.totalorder %s4817_s14, %s5465_s11  ;;  %p4316_p10 = scmp.lt.u32.totalorder %s4314_s6, %s4309_s29 }
  0x99   : > { %p4312_p3 = pnand %p4310_p7, %p4690_p12  ;;  %p4318_p13 = scmp.lt.u32.totalorder %s4309_s29, %s4817_s14 }
  0x9a   : > { %p4317_p4 = por %p4316_p10, %p4315_p6 }
  0x9b   : > { %p4313_p5 = pneg %p4312_p3 }
  0x9c   : > { %p4319_p1 = por %p4318_p13, %p4317_p4 }
  0x9e   : > { %p4320_p11 = pnand %p4319_p1, %p4313_p5 }
  0xa0   : > { %4323 = shalt.err (!%p4320_p11)
}
  0xa1   : > { %s4324_s20 = scalar_lea.vmem %s4847_s30, 2048  ;;  %s4517_s0 = smov [#allocation9]  }
  0xa2   : > { %p4325_p2 = scmp.ne.s32.totalorder %s4847_s30, %s4324_s20  ;;  %s4329_s3 = sshll.u32 %s4517_s0, 4  ;;  %s4330_s3 = int_to_ptr.vmem [resolvable:$false] %s4329_s3 }
  0xa3   : > { %s4331_s2 = scalar_lea.vmem %s4330_s3, 4096  ;;  %p4332_p7 = scmp.lt.s32.totalorder %s4847_s30, %s4330_s3 }
  0xa4   : > { %p4327_p9 = pnand %p4325_p2, %p4690_p12  ;;  %p4333_p3 = scmp.lt.s32.totalorder %s4331_s2, %s4324_s20 }
  0xa6   : > { %p4328_p0 = pneg %p4327_p9  ;;  %p4334_p6 = por %p4333_p3, %p4332_p7 }
  0xa8   : > { %p4335_p10 = pnand %p4334_p6, %p4328_p0 }
  0xaa   : > { %4338 = shalt.err (!%p4335_p10)
}
  0xab   : > { %s5521_s10 = scalar_lea.sflag [#allocation8], %s4672_s23  ;;  %s594_s24 = scalar_lea.vmem [#allocation12], %s4734_s5 }
  0xac   : > { %4049 = dma.hbm_to_vmem [thread:$0]  (!%p4667_p8), %s4817_s14, 2048, %s4847_s30, %s5521_s10, %s5519_s17, %s5519_s17, %s5518_s7  }
  0xad   : > { %s601_s29 = sshll.u32 %s594_s24, 4  ;;  %s4339_s21 = scalar_lea.hbm %s4853_s12, 4096  ;;  %s4882_s29 = int_to_ptr.vmem [resolvable:$true] %s601_s29 }
  0xae   : > { %p4340_p5 = scmp.ne.s32.totalorder %s4853_s12, %s4339_s21  ;;  %s4344_s28 = scalar_lea.hbm %s5467_s13, 12288 }
  0xaf   : > { %p4345_p1 = scmp.lt.u32.totalorder %s4853_s12, %s5467_s13  ;;  %p4346_p11 = scmp.lt.u32.totalorder %s4344_s28, %s4339_s21 }
  0xb0   : > { %p4342_p4 = pnand %p4340_p5, %p4690_p12  ;;  %p4348_p9 = scmp.lt.u32.totalorder %s4339_s21, %s4853_s12 }
  0xb1   : > { %p4347_p2 = por %p4346_p11, %p4345_p1 }
  0xb2   : > { %p4343_p13 = pneg %p4342_p4 }
  0xb3   : > { %p4349_p0 = por %p4348_p9, %p4347_p2 }
  0xb5   : > { %p4350_p7 = pnand %p4349_p0, %p4343_p13 }
  0xb7   : > { %4353 = shalt.err (!%p4350_p7)
}
  0xb8   : > { %s4354_s14 = scalar_lea.vmem %s4882_s29, 4096  ;;  %s4518_s30 = smov [#allocation12]  }
  0xb9   : > { %p4355_p3 = scmp.ne.s32.totalorder %s4882_s29, %s4354_s14  ;;  %s4359_s0 = sshll.u32 %s4518_s30, 4  ;;  %s4360_s0 = int_to_ptr.vmem [resolvable:$false] %s4359_s0 }
  0xba   : > { %s4361_s3 = scalar_lea.vmem %s4360_s0, 8192  ;;  %p4362_p5 = scmp.lt.s32.totalorder %s4882_s29, %s4360_s0 }
  0xbb   : > { %p4357_p6 = pnand %p4355_p3, %p4690_p12  ;;  %p4363_p4 = scmp.lt.s32.totalorder %s4361_s3, %s4354_s14 }
  0xbd   : > { %p4358_p10 = pneg %p4357_p6  ;;  %p4364_p1 = por %p4363_p4, %p4362_p5 }
  0xbf   : > { %p4365_p11 = pnand %p4364_p1, %p4358_p10 }
  0xc1   : > { %4368 = shalt.err (!%p4365_p11)
}
  0xc2   : > { %s4519_s2 = smov 256   ;;  %s4520_s10 = smov 16  }
  0xc3   : > { %s5522_s24 = scalar_lea.sflag [#allocation11], %s4672_s23  ;;  %s4914_s6 = scalar_lea.hbm %s5469_s15, %s4739_s26 }
  0xc4   : > { %4055 = dma.hbm_to_vmem [thread:$0]  (!%p4667_p8), %s4853_s12, 4096, %s4882_s29, %s5522_s24, %s4519_s2, %s4519_s2, %s4520_s10  }
  0xc5   : > { %s636_s28 = scalar_lea.vmem [#allocation15], %s4734_s5  ;;  %s4369_s20 = scalar_lea.hbm %s4914_s6, 4096 }
  0xc6   : > { %s643_s4 = sshll.u32 %s636_s28, 4  ;;  %p4370_p13 = scmp.ne.s32.totalorder %s4914_s6, %s4369_s20  ;;  %s4917_s4 = int_to_ptr.vmem [resolvable:$true] %s643_s4 }
  0xc7   : > { %s4374_s29 = scalar_lea.hbm %s5469_s15, 12288  ;;  %p4375_p0 = scmp.lt.u32.totalorder %s4914_s6, %s5469_s15 }
  0xc8   : > { %p4372_p2 = pnand %p4370_p13, %p4690_p12  ;;  %p4376_p7 = scmp.lt.u32.totalorder %s4374_s29, %s4369_s20 }
  0xc9   : > { %p4378_p6 = scmp.lt.u32.totalorder %s4369_s20, %s4914_s6 }
  0xca   : > { %p4373_p9 = pneg %p4372_p2  ;;  %p4377_p3 = por %p4376_p7, %p4375_p0 }
  0xcc   : > { %p4379_p10 = por %p4378_p6, %p4377_p3 }
  0xce   : > { %p4380_p5 = pnand %p4379_p10, %p4373_p9 }
  0xd0   : > { %4383 = shalt.err (!%p4380_p5)
}
  0xd1   : > { %s4384_s3 = scalar_lea.vmem %s4917_s4, 4096  ;;  %s4521_s24 = smov [#allocation15]  }
  0xd2   : > { %p4385_p4 = scmp.ne.s32.totalorder %s4917_s4, %s4384_s3  ;;  %s4389_s21 = sshll.u32 %s4521_s24, 4  ;;  %s4390_s21 = int_to_ptr.vmem [resolvable:$false] %s4389_s21 }
  0xd3   : > { %s4391_s27 = scalar_lea.vmem %s4390_s21, 8192  ;;  %p4392_p13 = scmp.lt.s32.totalorder %s4917_s4, %s4390_s21 }
  0xd4   : > { %p4387_p1 = pnand %p4385_p4, %p4690_p12  ;;  %p4393_p2 = scmp.lt.s32.totalorder %s4391_s27, %s4384_s3 }
  0xd6   : > { %p4388_p11 = pneg %p4387_p1  ;;  %p4394_p0 = por %p4393_p2, %p4392_p13 }
  0xd8   : > { %p4395_p7 = pnand %p4394_p0, %p4388_p11 }
  0xda   : > { %4398 = shalt.err (!%p4395_p7)
}
  0xdb   : > { %s5523_s28 = scalar_lea.sflag [#allocation14], %s4672_s23  ;;  %s4949_s12 = scalar_lea.hbm %s5470_s16, %s4739_s26 }
  0xdc   : > { %4061 = dma.hbm_to_vmem [thread:$0]  (!%p4667_p8), %s4914_s6, 4096, %s4917_s4, %s5523_s28, %s4519_s2, %s4519_s2, %s4520_s10  }
  0xdd   : > { %s657_s29 = scalar_lea.vmem [#allocation16], %s4734_s5  ;;  %s654_s23 = scalar_lea.sflag [#allocation17], %s4659_s1 }
  0xde   : > { %s664_s30 = sshll.u32 %s657_s29, 4  ;;  %s4399_s0 = scalar_lea.hbm %s4949_s12, 4096  ;;  %s4952_s30 = int_to_ptr.vmem [resolvable:$true] %s664_s30 }
  0xdf   : > { %p4400_p9 = scmp.ne.s32.totalorder %s4949_s12, %s4399_s0  ;;  %s4404_s6 = scalar_lea.hbm %s5470_s16, 12288 }
  0xe0   : > { %p4405_p10 = scmp.lt.u32.totalorder %s4949_s12, %s5470_s16  ;;  %p4406_p5 = scmp.lt.u32.totalorder %s4404_s6, %s4399_s0 }
  0xe1   : > { %p4402_p3 = pnand %p4400_p9, %p4690_p12  ;;  %p4408_p1 = scmp.lt.u32.totalorder %s4399_s0, %s4949_s12 }
  0xe2   : > { %p4407_p4 = por %p4406_p5, %p4405_p10 }
  0xe3   : > { %p4403_p6 = pneg %p4402_p3 }
  0xe4   : > { %p4409_p11 = por %p4408_p1, %p4407_p4 }
  0xe6   : > { %p4410_p13 = pnand %p4409_p11, %p4403_p6 }
  0xe8   : > { %4413 = shalt.err (!%p4410_p13)
}
  0xe9   : > { %s4414_s5 = scalar_lea.vmem %s4952_s30, 4096  ;;  %s4522_s3 = smov [#allocation16]  }
  0xea   : > { %p4415_p2 = scmp.ne.s32.totalorder %s4952_s30, %s4414_s5  ;;  %s4419_s24 = sshll.u32 %s4522_s3, 4  ;;  %s4420_s24 = int_to_ptr.vmem [resolvable:$false] %s4419_s24 }
  0xeb   : > { %s4421_s21 = scalar_lea.vmem %s4420_s24, 8192  ;;  %p4422_p9 = scmp.lt.s32.totalorder %s4952_s30, %s4420_s24 }
  0xec   : > { %p4417_p0 = pnand %p4415_p2, %p4690_p12  ;;  %p4423_p3 = scmp.lt.s32.totalorder %s4421_s21, %s4414_s5 }
  0xee   : > { %p4418_p7 = pneg %p4417_p0  ;;  %p4424_p10 = por %p4423_p3, %p4422_p9 }
  0xf0   : > { %p4425_p5 = pnand %p4424_p10, %p4418_p7 }
  0xf2   : > { %4428 = shalt.err (!%p4425_p5)
}
  0xf3   : > { %4064 = dma.hbm_to_vmem [thread:$0]  (!%p4667_p8), %s4949_s12, 4096, %s4952_s30, %s654_s23, %s5519_s17, %s5519_s17, %s5518_s7  }
  0xf4   : > { %p5524_p12 = scmp.ne.s32.totalorder %s5516_s18, 0 }
  0xf5   : > { %s678_s8 = sand.u32 (!%p5524_p12), 1, %s4501_s25   ;;  %p5525_p6 = scmp.ne.s32.totalorder (!%p5524_p12), %s5509_s19, 0 }
  0xf6   : > { %676 = sbr.rel (%p5524_p12) target bundleno = 2014 (0x7de), region = 88  ;;  %s3028_s27 = sshll.u32 (!%p5524_p12), %s678_s8, 7 }
  0xf7   : > { %s679_s28 = scalar_lea.sflag (!%p5524_p12), [#allocation5], %s678_s8  ;;  %s4984_s20 = scalar_lea.vmem (!%p5524_p12), [#allocation4], %s3028_s27 }
  0xfd   : > { %4472 = dma.done.wait (%p5525_p6), %s679_s28, 2048  }
  0xfe   : > { %4474 = vsyncadd (%p5525_p6), %s679_s28, 4294965248  ;;  %s5526_s22 = sld [smem:[#allocation26_spill]]  ;;  %s4991_s7 = scalar_lea.vmem [#allocation7], %s3028_s27 }
 0x104   : > { %s687_s1 = sand.u32 1, %s5526_s22  }
 0x105   : > { %s688_s14 = scalar_lea.sflag [#allocation8], %s687_s1 }
 0x106   : > { %4476 = dma.done.wait (%p5525_p6), %s688_s14, 4096  }
 0x107   : > { %4478 = vsyncadd (%p5525_p6), %s688_s14, 4294963200  ;;  %s4997_s18 = scalar_lea.vmem [#allocation9], %s3028_s27  ;;  %s706_s17 = scalar_lea.sflag [#allocation11], %s687_s1 }
 0x108   : > { %s4999_s12 = scalar_lea.vmem [#allocation10], %s3028_s27 }
 0x109   : > { %4480 = dma.done.wait (%p5525_p6), %s706_s17, 6144  }
 0x10a   : > { %4482 = vsyncadd (%p5525_p6), %s706_s17, 4294961152  ;;  %s3032_s29 = sshll.u32 %s678_s8, 8  ;;  %s724_s23 = scalar_lea.sflag [#allocation14], %s687_s1 }
 0x10b   : > { %s5005_s30 = scalar_lea.vmem [#allocation12], %s3032_s29  ;;  %s5007_s0 = scalar_lea.vmem [#allocation13], %s3032_s29 }
 0x10c   : > { %4484 = dma.done.wait (%p5525_p6), %s724_s23, 8192  }
 0x10d   : > { %4486 = vsyncadd (%p5525_p6), %s724_s23, 4294959104  ;;  %s5013_s2 = scalar_lea.vmem [#allocation15], %s3032_s29  ;;  %s742_s10 = scalar_lea.sflag [#allocation17], %s678_s8 }
 0x10e   : > { %s5015_s6 = scalar_lea.vmem [#allocation16], %s3032_s29 }
 0x10f   : > { %4488 = dma.done.wait (%p5525_p6), %s742_s10, 4096  }
 0x110   : > { %4490 = vsyncadd (%p5525_p6), %s742_s10, 4294963200  ;;  %p3036_p8 = scmp.ne.s32.totalorder %s5526_s22, 0 }
 0x111   : > { %s5527_s5 = sld [smem:[#allocation33_spill]] (!%p3036_p8)  ;;  %vm962_vm0 = vcmask (!%p3036_p8), 1045504   ;;  %s5528_s21 = sld [smem:[#allocation30_spill]] (!%p3036_p8)  ;;  %vm943_vm1 = vcmask (!%p3036_p8), 48128   ;;  %vm848_vm2 = vcmask (!%p3036_p8), 1043456   ;;  %vm4523_vm3 = vmmov (!%p3036_p8), 1  }
 0x112   : > { %829 = sbr.rel (%p3036_p8) target bundleno = 506 (0x1fa), region = 124  ;;  %s5529_s22 = sld [smem:[#allocation31_spill]] (!%p3036_p8)  ;;  %vm3691_vm4 = vmpackc.low (!%p3036_p8), %vm848_vm2, %vm4523_vm3  ;;  %vm841_vm5 = vcmask (!%p3036_p8), 97280  }
 0x113   : > { %s5530_s26 = sld [smem:[#allocation29_spill]] (!%p3036_p8)  ;;  %s5532_s29 = sld [smem:[#allocation34_spill]] (!%p3036_p8) }
 0x117   : > { %v935_v0 = vld [vmem:[%s5527_s5] sm:$0x3f] (!%p3036_p8)  ;;  %v930_v2 = vld [vmem:[%s5528_s21 + $0x8] sm:$0xff] (!%p3036_p8)  ;;  %v931_v5 = vld [vmem:[%s5528_s21 + $0x10] sm:$0xff] (!%p3036_p8) }
 0x118   : > { %v929_v1 = vld [vmem:[%s5528_s21] sm:$0xff] (!%p3036_p8)  ;;  %3423 = vmatprep.subr.msk.mxu1 (!%p3036_p8), %vm962_vm0, %v935_v0  ;;  %v833_v4 = vld [vmem:[%s5529_s22 + $0x8] sm:$0xf] (!%p3036_p8)  ;;  %v932_v8 = vld [vmem:[%s5528_s21 + $0x18] sm:$0xff] (!%p3036_p8) }
 0x119   : > { %3425 = vmatprep.mubr.msk.f32.mxu1 %vm943_vm1, %v929_v1  ;;  %v832_v3 = vld [vmem:[%s5529_s22] sm:$0xff]  ;;  %3424 = vmatpush3.msk.msra.mxu1 %vm962_vm0, %v935_v0  ;;  %s5531_s4 = smov %s5530_s26  ;;  %v934_v11 = vld [vmem:[%s5528_s21 + $0x28] sm:$0xff] }
 0x11a   : > { %v3690_v6 = vpack.c.bf16 %v833_v4, %v832_v3  ;;  %v830_v7 = vld [vmem:[%s5530_s26] sm:$0xff]  ;;  %3426 = vmatmul.mubr.msk.f32.vlgmr.msra.gmra.mrb[0].mxu1 %vm943_vm1, %v930_v2  ;;  %v831_v9 = vld [vmem:[%s5531_s4 + $0x8] sm:$0xff]  ;;  %s5533_s26 = sld [smem:[#allocation32_spill]] }
 0x11b   : > { %3420 = vmatprep.mubr.msk.f32.mxu0 %vm841_vm5, %v830_v7  ;;  %3428 = vmatprep.mubr.msk.f32.mxu1 %vm943_vm1, %v931_v5  ;;  %v933_v10 = vld [vmem:[%s5528_s21 + $0x20] sm:$0xff] }
 0x11c   : > { %3692 = vmatprep.subr.msk.bf16.mxu0 %vm3691_vm4, %v3690_v6  ;;  %v3041_v12 = vld [vmem:[%s5532_s29] ss:$0 sm:$0xff] }
 0x11d   : > { %3695 = vmatpush3.bf16.msk.msra.mxu0 %vm3691_vm4, %v3690_v6 }
 0x11e   : > { %3429 = vmatmul.mubr.msk.f32.gmra.mrb[2].mxu1 %vm943_vm1, %v932_v8 }
 0x11f   : > { %3431 = vmatprep.mubr.msk.f32.mxu1 %vm943_vm1, %v933_v10 }
 0x120   : > { %3421 = vmatmul.mubr.msk.f32.vlgmr.msra.gmra.mrb[0].mxu0 %vm841_vm5, %v831_v9  ;;  %v3037_v17 = vld [vmem:[%s5533_s26] ss:$0 sm:$0xff] }
 0x122   : > { %3432 = vmatmul.mubr.msk.f32.gmra.mrb[4].mxu1 %vm943_vm1, %v934_v11 }
 0x1ed   : > { %v3427_v13 = vpop.f32.mrb[0].mxu1 }
 0x1ee   : > { %v1038_v14 = vadd.f32 %v3427_v13, %v3041_v12  ;;  %v1032_v15 = vpop.f32.mrb[1].mxu1 }
 0x1ef   : > { %v1033_v16 = vadd.f32 %v3041_v12, %v1032_v15 }
 0x1f0   : > { %1062 = vst [vmem:[#allocation3 + $0x8] sm:$0xff] %v1038_v14 }
 0x1f1   : > { %1061 = vst [vmem:[#allocation3] sm:$0xff] %v1033_v16  ;;  %v3430_v18 = vpop.f32.mrb[2].mxu1 }
 0x1f2   : > { %v1048_v19 = vadd.f32 %v3430_v18, %v3041_v12  ;;  %v1042_v20 = vpop.f32.mrb[3].mxu1 }
 0x1f3   : > { %v3422_v21 = vpop.f32.mrb[0].mxu0  ;;  %v1043_v22 = vadd.f32 %v3041_v12, %v1042_v20 }
 0x1f4   : > { %v924_v23 = vadd.f32 %v3422_v21, %v3037_v17  ;;  %v918_v24 = vpop.f32.mrb[1].mxu0  ;;  %1064 = vst [vmem:[#allocation3 + $0x18] sm:$0xff] %v1048_v19 }
 0x1f5   : > { %v919_v25 = vadd.f32 %v3037_v17, %v918_v24  ;;  %1063 = vst [vmem:[#allocation3 + $0x10] sm:$0xff] %v1043_v22  ;;  %v3433_v26 = vpop.f32.mrb[4].mxu1 }
 0x1f6   : > { %928 = vst [vmem:[#allocation2 + $0x8] sm:$0xff] %v924_v23  ;;  %v1058_v27 = vadd.f32 %v3433_v26, %v3041_v12  ;;  %v1052_v28 = vpop.f32.mrb[5].mxu1 }
 0x1f7   : > { %927 = vst [vmem:[#allocation2] sm:$0xff] %v919_v25  ;;  %v1053_v29 = vadd.f32 %v3041_v12, %v1052_v28 }
 0x1f8   : > { %1066 = vst [vmem:[#allocation3 + $0x28] sm:$0xff] %v1058_v27 }
 0x1f9   : > { %1065 = vst [vmem:[#allocation3 + $0x20] sm:$0xff] %v1053_v29 }
 0x1fa PF: > { %v1131_v30 = vld [vmem:[%s4984_s20] sm:$0xff]  ;;  %v1132_v31 = vld [vmem:[%s4984_s20 + $0x8] sm:$0xff]  ;;  %v1133_v35 = vld [vmem:[%s4984_s20 + $0x10] sm:$0xff]  ;;  %s5535_s24 = sld [smem:[#allocation36_spill]]  ;;  %vm1515_vm6 = vcmask 130048   ;;  %s5537_s23 = sld [smem:[#allocation37_spill]] }
 0x1fb   : > { %v1222_v32 = vld [vmem:[%s4991_s7] sm:$0xff]  ;;  %v3696_v33 = vpack.c.bf16 %v1132_v31, %v1131_v30  ;;  %v1223_v34 = vld [vmem:[%s4991_s7 + $0x8] sm:$0xff]  ;;  %v1134_v36 = vld [vmem:[%s4984_s20 + $0x18] sm:$0xff]  ;;  %vm2024_vm7 = vcmask 392192  }
 0x1fc   : > { %v3728_v37 = vpack.c.bf16 %v1223_v34, %v1222_v32  ;;  %v3700_v38 = vpack.c.bf16 %v1134_v36, %v1133_v35  ;;  %v1224_v39 = vld [vmem:[%s4991_s7 + $0x10] sm:$0xff]  ;;  %v1225_v40 = vld [vmem:[%s4991_s7 + $0x18] sm:$0xff]  ;;  %v1135_v41 = vld [vmem:[%s4984_s20 + $0x20] sm:$0xff] }
 0x1fd   : > { %3697 = vmatprep.subr.bf16.mxu0 %v3696_v33  ;;  %v3732_v42 = vpack.c.bf16 %v1225_v40, %v1224_v39  ;;  %v1136_v43 = vld [vmem:[%s4984_s20 + $0x28] sm:$0xff]  ;;  %v1226_v44 = vld [vmem:[%s4991_s7 + $0x20] sm:$0xff]  ;;  %v1137_v48 = vld [vmem:[%s4984_s20 + $0x30] sm:$0xff] }
 0x1fe   : > { %v1227_v45 = vld [vmem:[%s4991_s7 + $0x28] sm:$0xff]  ;;  %3729 = vmatprep.subr.bf16.mxu1 %v3728_v37  ;;  %3699 = vmatpush3.bf16.msra.mxu0 %v3696_v33  ;;  %v3704_v46 = vpack.c.bf16 %v1136_v43, %v1135_v41  ;;  %v1138_v49 = vld [vmem:[%s4984_s20 + $0x38] sm:$0xff]  ;;  %v1228_v50 = vld [vmem:[%s4991_s7 + $0x30] sm:$0xff] }
 0x1ff   : > { %3731 = vmatpush3.bf16.msra.mxu1 %v3728_v37  ;;  %3701 = vmatprep.subr.bf16.mxu0 %v3700_v38  ;;  %v3736_v47 = vpack.c.bf16 %v1227_v45, %v1226_v44  ;;  %v1229_v51 = vld [vmem:[%s4991_s7 + $0x38] sm:$0xff]  ;;  %v3708_v52 = vpack.c.bf16 %v1138_v49, %v1137_v48  ;;  %v1139_v54 = vld [vmem:[%s4984_s20 + $0x40] sm:$0xff]  ;;  %v1140_v55 = vld [vmem:[%s4984_s20 + $0x48] sm:$0xff] }
 0x200   : > { %3733 = vmatprep.subr.bf16.mxu1 %v3732_v42  ;;  %v3740_v53 = vpack.c.bf16 %v1229_v51, %v1228_v50  ;;  %v5085_v56 = vld [vmem:[#allocation2] sm:$0xff]  ;;  %v1231_v58 = vld [vmem:[%s4991_s7 + $0x48] sm:$0xff]  ;;  %v3712_v59 = vpack.c.bf16 %v1140_v55, %v1139_v54  ;;  %v1141_v61 = vld [vmem:[%s4984_s20 + $0x50] sm:$0xff]  ;;  %s5536_s8 = smov %s5535_s24 }
 0x201   : > { %v1230_v57 = vld [vmem:[%s4991_s7 + $0x40] sm:$0xff]  ;;  %3466 = vmatprep.mubr.f32.mxu0 %v5085_v56  ;;  %3501 = vmatprep.mubr.f32.mxu1 %v5085_v56  ;;  %v1142_v62 = vld [vmem:[%s4984_s20 + $0x58] sm:$0xff]  ;;  %v1232_v63 = vld [vmem:[%s4991_s7 + $0x50] sm:$0xff] }
 0x202   : > { %3703 = vmatpush3.bf16.msra.mxu0 %v3700_v38  ;;  %v3744_v60 = vpack.c.bf16 %v1231_v58, %v1230_v57  ;;  %v1233_v0 = vld [vmem:[%s4991_s7 + $0x58] sm:$0xff]  ;;  %v3716_v1 = vpack.c.bf16 %v1142_v62, %v1141_v61  ;;  %v1143_v3 = vld [vmem:[%s4984_s20 + $0x60] sm:$0xff]  ;;  %v1144_v4 = vld [vmem:[%s4984_s20 + $0x68] sm:$0xff] }
 0x203   : > { %3735 = vmatpush3.bf16.msra.mxu1 %v3732_v42  ;;  %3705 = vmatprep.subr.bf16.mxu0 %v3704_v46  ;;  %v3748_v2 = vpack.c.bf16 %v1233_v0, %v1232_v63  ;;  %v1234_v5 = vld [vmem:[%s4991_s7 + $0x60] sm:$0xff]  ;;  %v1235_v6 = vld [vmem:[%s4991_s7 + $0x68] sm:$0xff]  ;;  %v3720_v7 = vpack.c.bf16 %v1144_v4, %v1143_v3  ;;  %v1145_v9 = vld [vmem:[%s4984_s20 + $0x70] sm:$0xff] }
 0x204   : > { %3737 = vmatprep.subr.bf16.mxu1 %v3736_v47  ;;  %v3752_v8 = vpack.c.bf16 %v1235_v6, %v1234_v5  ;;  %v1146_v10 = vld [vmem:[%s4984_s20 + $0x78] sm:$0xff]  ;;  %v1236_v11 = vld [vmem:[%s4991_s7 + $0x70] sm:$0xff]  ;;  %v1313_v15 = vld [vmem:[%s4997_s18] sm:$0xff] }
 0x205   : > { %v1237_v12 = vld [vmem:[%s4991_s7 + $0x78] sm:$0xff]  ;;  %v3724_v13 = vpack.c.bf16 %v1146_v10, %v1145_v9  ;;  %v1314_v16 = vld [vmem:[%s4997_s18 + $0x8] sm:$0xff]  ;;  %v1404_v17 = vld [vmem:[%s4999_s12] sm:$0xff] }
 0x206   : > { %3707 = vmatpush3.bf16.msra.mxu0 %v3704_v46  ;;  %v3756_v14 = vpack.c.bf16 %v1237_v12, %v1236_v11  ;;  %v1405_v18 = vld [vmem:[%s4999_s12 + $0x8] sm:$0xff]  ;;  %v3760_v19 = vpack.c.bf16 %v1314_v16, %v1313_v15  ;;  %v1315_v21 = vld [vmem:[%s4997_s18 + $0x10] sm:$0xff]  ;;  %v1316_v22 = vld [vmem:[%s4997_s18 + $0x18] sm:$0xff] }
 0x207   : > { %3739 = vmatpush3.bf16.msra.mxu1 %v3736_v47  ;;  %3709 = vmatprep.subr.bf16.mxu0 %v3708_v52  ;;  %v3792_v20 = vpack.c.bf16 %v1405_v18, %v1404_v17  ;;  %v1406_v23 = vld [vmem:[%s4999_s12 + $0x10] sm:$0xff]  ;;  %v1407_v24 = vld [vmem:[%s4999_s12 + $0x18] sm:$0xff]  ;;  %v5111_v25 = vld [vmem:[#allocation2 + $0x8] sm:$0xff]  ;;  %v3764_v26 = vpack.c.bf16 %v1316_v22, %v1315_v21 }
 0x208   : > { %3741 = vmatprep.subr.bf16.mxu1 %v3740_v53  ;;  %v3796_v27 = vpack.c.bf16 %v1407_v24, %v1406_v23  ;;  %v1317_v28 = vld [vmem:[%s4997_s18 + $0x20] sm:$0xff]  ;;  %v1318_v29 = vld [vmem:[%s4997_s18 + $0x28] sm:$0xff]  ;;  %v1069_v32 = vld [vmem:[#allocation3] sm:$0xff] }
 0x209   : > { %v1408_v30 = vld [vmem:[%s4999_s12 + $0x20] sm:$0xff]  ;;  %v1409_v31 = vld [vmem:[%s4999_s12 + $0x28] sm:$0xff]  ;;  %v3768_v33 = vpack.c.bf16 %v1318_v29, %v1317_v28  ;;  %v1319_v35 = vld [vmem:[%s4997_s18 + $0x30] sm:$0xff] }
 0x20a   : > { %3711 = vmatpush3.bf16.msra.mxu0 %v3708_v52  ;;  %v3800_v34 = vpack.c.bf16 %v1409_v31, %v1408_v30  ;;  %v1320_v36 = vld [vmem:[%s4997_s18 + $0x38] sm:$0xff]  ;;  %v1410_v37 = vld [vmem:[%s4999_s12 + $0x30] sm:$0xff]  ;;  %v1321_v41 = vld [vmem:[%s4997_s18 + $0x40] sm:$0xff] }
 0x20b   : > { %3743 = vmatpush3.bf16.msra.mxu1 %v3740_v53  ;;  %3713 = vmatprep.subr.bf16.mxu0 %v3712_v59  ;;  %v1411_v38 = vld [vmem:[%s4999_s12 + $0x38] sm:$0xff]  ;;  %v3772_v39 = vpack.c.bf16 %v1320_v36, %v1319_v35  ;;  %v1322_v42 = vld [vmem:[%s4997_s18 + $0x48] sm:$0xff]  ;;  %v1412_v43 = vld [vmem:[%s4999_s12 + $0x40] sm:$0xff] }
 0x20c   : > { %3745 = vmatprep.subr.bf16.mxu1 %v3744_v60  ;;  %v3804_v40 = vpack.c.bf16 %v1411_v38, %v1410_v37  ;;  %v1413_v44 = vld [vmem:[%s4999_s12 + $0x48] sm:$0xff]  ;;  %v3776_v45 = vpack.c.bf16 %v1322_v42, %v1321_v41  ;;  %v1323_v47 = vld [vmem:[%s4997_s18 + $0x50] sm:$0xff]  ;;  %v1324_v48 = vld [vmem:[%s4997_s18 + $0x58] sm:$0xff] }
 0x20d   : > { %v3808_v46 = vpack.c.bf16 %v1413_v44, %v1412_v43  ;;  %v1414_v49 = vld [vmem:[%s4999_s12 + $0x50] sm:$0xff]  ;;  %v1415_v50 = vld [vmem:[%s4999_s12 + $0x58] sm:$0xff]  ;;  %v3780_v51 = vpack.c.bf16 %v1324_v48, %v1323_v47  ;;  %v1325_v53 = vld [vmem:[%s4997_s18 + $0x60] sm:$0xff] }
 0x20e   : > { %3715 = vmatpush3.bf16.msra.mxu0 %v3712_v59  ;;  %v3812_v52 = vpack.c.bf16 %v1415_v50, %v1414_v49  ;;  %v1326_v54 = vld [vmem:[%s4997_s18 + $0x68] sm:$0xff]  ;;  %v1416_v55 = vld [vmem:[%s4999_s12 + $0x60] sm:$0xff]  ;;  %v1418_v59 = vld [vmem:[%s4999_s12 + $0x70] sm:$0xff] }
 0x20f   : > { %3747 = vmatpush3.bf16.msra.mxu1 %v3744_v60  ;;  %3717 = vmatprep.subr.bf16.mxu0 %v3716_v1  ;;  %v3784_v57 = vpack.c.bf16 %v1326_v54, %v1325_v53  ;;  %v1419_v60 = vld [vmem:[%s4999_s12 + $0x78] sm:$0xff]  ;;  %v1071_v63 = vld [vmem:[#allocation3 + $0x10] sm:$0xff]  ;;  %v1327_v0 = vld [vmem:[%s4997_s18 + $0x70] sm:$0xff] }
 0x210   : > { %3749 = vmatprep.subr.bf16.mxu1 %v3748_v2  ;;  %v3820_v61 = vpack.c.bf16 %v1419_v60, %v1418_v59  ;;  %v1070_v62 = vld [vmem:[#allocation3 + $0x8] sm:$0xff]  ;;  %v1072_v3 = vld [vmem:[#allocation3 + $0x18] sm:$0xff]  ;;  %v1073_v4 = vld [vmem:[#allocation3 + $0x20] sm:$0xff] }
 0x211   : > { %v1074_v5 = vld [vmem:[#allocation3 + $0x28] sm:$0xff]  ;;  %v3170_v11 = vld [vmem:[%s5536_s8 + $0x8] sm:$0xff]   ;;  %v3137_v24 = vld [vmem:[%s5537_s23] sm:$0xff]  }
 0x212   : > { %3719 = vmatpush3.bf16.msra.mxu0 %v3716_v1  ;;  %v1328_v1 = vld [vmem:[%s4997_s18 + $0x78] sm:$0xff]  ;;  %v3130_v12 = vunpack.c.l.bf16 %v3170_v11  ;;  %v3172_v28 = vld [vmem:[%s5537_s23 + $0x8] sm:$0xff]   ;;  %v3173_v31 = vld [vmem:[%s5537_s23 + $0x10] sm:$0xff]  }
 0x213   : > { %3751 = vmatpush3.bf16.msra.mxu1 %v3748_v2  ;;  %3721 = vmatprep.subr.bf16.mxu0 %v3720_v7  ;;  %v3788_v2 = vpack.c.bf16 %v1328_v1, %v1327_v0  ;;  %v3176_v35 = vld [vmem:[%s5537_s23 + $0x28] sm:$0xff]  }
 0x214   : > { %3753 = vmatprep.subr.bf16.mxu1 %v3752_v8 }
 0x216   : > { %3723 = vmatpush3.bf16.msra.mxu0 %v3720_v7  ;;  %v3125_v7 = vld [vmem:[%s5535_s24] sm:$0xff]  }
 0x217   : > { %3755 = vmatpush3.bf16.msra.mxu1 %v3752_v8  ;;  %3725 = vmatprep.subr.bf16.mxu0 %v3724_v13  ;;  %v3126_v9 = vunpack.c.l.bf16 %v3125_v7  ;;  %v3127_v10 = vunpack.c.h.bf16 %v3125_v7 }
 0x218   : > { %3757 = vmatprep.subr.bf16.mxu1 %v3756_v14 }
 0x219   : > { %1992 = vxpose.xlu0.b32.start [1/6] (short) (narrow) %v3126_v9, 16 }
 0x21a   : > { %3727 = vmatpush3.bf16.msra.mxu0 %v3724_v13  ;;  %v3131_v13 = vunpack.c.h.bf16 %v3170_v11 }
 0x21b   : > { %3759 = vmatpush3.bf16.msra.mxu1 %v3756_v14  ;;  %3761 = vmatprep.subr.bf16.mxu0 %v3760_v19  ;;  %v3171_v14 = vld [vmem:[%s5536_s8 + $0x10] sm:$0xff]  }
 0x21c   : > { %3793 = vmatprep.subr.bf16.mxu1 %v3792_v20  ;;  %v3134_v15 = vunpack.c.l.bf16 %v3171_v14  ;;  %v3135_v16 = vunpack.c.h.bf16 %v3171_v14 }
 0x21d   : > { %3467 = vmatmul.mubr.f32.vlgmr.msra.gmra.mrb[0].mxu0 %v5111_v25  ;;  %1993 = vxpose.xlu0.b32.cont [2/6] (short) (narrow) %v3127_v10, 16 }
 0x21e   : > { %3502 = vmatmul.mubr.f32.vlgmr.msra.gmra.mrb[0].mxu1 %v5111_v25  ;;  %3763 = vmatpush3.bf16.msra.mxu0 %v3760_v19 }
 0x21f   : > { %3795 = vmatpush3.bf16.msra.mxu1 %v3792_v20  ;;  %3765 = vmatprep.subr.bf16.mxu0 %v3764_v26 }
 0x220   : > { %3797 = vmatprep.subr.bf16.mxu1 %v3796_v27  ;;  %3571 = vmatprep.mubr.f32.mxu1 %v1069_v32 }
 0x221   : > { %3536 = vmatprep.mubr.f32.mxu0 %v5085_v56  ;;  %v1417_v56 = vld [vmem:[%s4999_s12 + $0x68] sm:$0xff]  ;;  %s5534_s12 = sld [smem:[#allocation35_spill]]  ;;  %1994 = vxpose.xlu0.b32.cont [3/6] (short) (narrow) %v3130_v12, 16 }
 0x222   : > { %3767 = vmatpush3.bf16.msra.mxu0 %v3764_v26  ;;  %v3816_v58 = vpack.c.bf16 %v1417_v56, %v1416_v55 }
 0x223   : > { %3799 = vmatpush3.bf16.msra.mxu1 %v3796_v27  ;;  %3769 = vmatprep.subr.bf16.mxu0 %v3768_v33 }
 0x224   : > { %3801 = vmatprep.subr.bf16.mxu1 %v3800_v34 }
 0x225   : > { %1995 = vxpose.xlu0.b32.cont [4/6] (short) (narrow) %v3131_v13, 16 }
 0x226   : > { %3771 = vmatpush3.bf16.msra.mxu0 %v3768_v33  ;;  %v3174_v33 = vld [vmem:[%s5537_s23 + $0x18] sm:$0xff]  }
 0x227   : > { %3803 = vmatpush3.bf16.msra.mxu1 %v3800_v34  ;;  %3773 = vmatprep.subr.bf16.mxu0 %v3772_v39  ;;  %v5144_v6 = vld [vmem:[%s5534_s12] sm:$0xff]   ;;  %v3168_v23 = vld [vmem:[%s5534_s12 + $0x8] sm:$0xff]   ;;  %v3169_v27 = vld [vmem:[%s5534_s12 + $0x10] sm:$0xff]  }
 0x228   : > { %3805 = vmatprep.subr.bf16.mxu1 %v3804_v40  ;;  %v3114_v8 = vunpack.c.l.bf16 %v5144_v6  ;;  %v3118_v26 = vunpack.c.l.bf16 %v3168_v23  ;;  %v3119_v29 = vunpack.c.h.bf16 %v3168_v23  ;;  %v3122_v30 = vunpack.c.l.bf16 %v3169_v27  ;;  %v3175_v34 = vld [vmem:[%s5537_s23 + $0x20] sm:$0xff]  }
 0x229   : > { %1996 = vxpose.xlu0.b32.cont [5/6] (short) (narrow) %v3134_v15, 16  ;;  %v3123_v32 = vunpack.c.h.bf16 %v3169_v27 }
 0x22a   : > { %3775 = vmatpush3.bf16.msra.mxu0 %v3772_v39 }
 0x22b   : > { %3807 = vmatpush3.bf16.msra.mxu1 %v3804_v40  ;;  %3777 = vmatprep.subr.bf16.mxu0 %v3776_v45 }
 0x22c   : > { %3809 = vmatprep.subr.bf16.mxu1 %v3808_v46 }
 0x22d   : > { %1997 = vxpose.xlu0.b32.end [6/6] (short) (narrow) %v3135_v16, 16 }
 0x22e   : > { %3779 = vmatpush3.bf16.msra.mxu0 %v3776_v45  ;;  %v3177_v45 = vld [vmem:[%s5537_s23 + $0x30] sm:$0xff]  }
 0x22f   : > { %3811 = vmatpush3.bf16.msra.mxu1 %v3808_v46  ;;  %3781 = vmatprep.subr.bf16.mxu0 %v3780_v51  ;;  %v3178_v46 = vld [vmem:[%s5537_s23 + $0x38] sm:$0xff]  }
 0x230   : > { %3813 = vmatprep.subr.bf16.mxu1 %v3812_v52 }
 0x232   : > { %3783 = vmatpush3.bf16.msra.mxu0 %v3780_v51 }
 0x233   : > { %3815 = vmatpush3.bf16.msra.mxu1 %v3812_v52  ;;  %3785 = vmatprep.subr.bf16.mxu0 %v3784_v57 }
 0x234   : > { %3817 = vmatprep.subr.bf16.mxu1 %v3816_v58 }
 0x236   : > { %3787 = vmatpush3.bf16.msra.mxu0 %v3784_v57 }
 0x237   : > { %3819 = vmatpush3.bf16.msra.mxu1 %v3816_v58  ;;  %3789 = vmatprep.subr.bf16.mxu0 %v3788_v2 }
 0x238   : > { %3821 = vmatprep.subr.bf16.mxu1 %v3820_v61 }
 0x23a   : > { %3791 = vmatpush3.bf16.msra.mxu0 %v3788_v2 }
 0x23b   : > { %3823 = vmatpush3.bf16.msra.mxu1 %v3820_v61 }
 0x23d   : > { %3537 = vmatmul.mubr.f32.vlgmr.msra.gmra.mrb[2].mxu0 %v5111_v25  ;;  %v3115_v25 = vunpack.c.h.bf16 %v5144_v6 }
 0x23e   : > { %3572 = vmatmul.mubr.f32.vlgmr.msra.gmra.mrb[2].mxu1 %v1070_v62  ;;  %3584 = vmatprep.mubr.msk.f32.mxu0 %vm1515_vm6, %v3114_v8 }
 0x23f   : > { %3574 = vmatprep.mubr.f32.mxu1 %v1071_v63 }
 0x242   : > { %3575 = vmatmul.mubr.f32.gmra.mrb[4].mxu1 %v1072_v3 }
 0x243   : > { %3577 = vmatprep.mubr.f32.mxu1 %v1073_v4 }
 0x246   : > { %3578 = vmatmul.mubr.f32.gmra.mrb[6].mxu1 %v1074_v5 }
 0x247   : > { %3597 = vmatprep.mubr.msk.f32.mxu1 %vm1515_vm6, %v3126_v9 }
 0x2f0   : > { %v3468_v17 = vpop.f32.mrb[0].mxu0 }
 0x2f1   : > { %v3503_v18 = vpop.f32.mrb[0].mxu1  ;;  %v1213_v19 = vpop.f32.mrb[1].mxu0 }
 0x2f2   : > { %v3828_v20 = vpack.c.bf16 %v3468_v17, %v1213_v19  ;;  %v1304_v21 = vpop.f32.mrb[1].mxu1 }
 0x2f3   : > { %v3824_v22 = vpack.c.bf16 %v3503_v18, %v1304_v21 }
 0x2f4   : > { %3829 = vmatprep.subr.bf16.mxu1 %v3828_v20 }
 0x2f5   : > { %3825 = vmatprep.subr.bf16.mxu0 %v3824_v22  ;;  %3831 = vmatpush3.bf16.msra.mxu1 %v3828_v20 }
 0x2f6   : > { %3827 = vmatpush3.bf16.msra.mxu0 %v3824_v22  ;;  %3837 = vmatprep.subr.bf16.mxu1 %v3137_v24 }
 0x2f8   : > { %3598 = vmatmul.mubr.msk.f32.vlgmr.msra.gmra.mrb[8].mxu1 %vm1515_vm6, %v3127_v10 }
 0x2f9   : > { %3585 = vmatmul.mubr.msk.f32.vlgmr.msra.gmra.mrb[4].mxu0 %vm1515_vm6, %v3115_v25  ;;  %3600 = vmatprep.mubr.msk.f32.mxu1 %vm1515_vm6, %v3130_v12 }
 0x2fa   : > { %3587 = vmatprep.mubr.msk.f32.mxu0 %vm1515_vm6, %v3118_v26  ;;  %3839 = vmatpush3.bf16.msra.mxu1 %v3137_v24 }
 0x2fb   : > { %3841 = vmatprep.subr.bf16.mxu1 %v3172_v28 }
 0x2fc   : > { %3601 = vmatmul.mubr.msk.f32.gmra.mrb[10].mxu1 %vm1515_vm6, %v3131_v13 }
 0x2fd   : > { %3588 = vmatmul.mubr.msk.f32.gmra.mrb[6].mxu0 %vm1515_vm6, %v3119_v29  ;;  %3603 = vmatprep.mubr.msk.f32.mxu1 %vm1515_vm6, %v3134_v15 }
 0x2fe   : > { %3590 = vmatprep.mubr.msk.f32.mxu0 %vm1515_vm6, %v3122_v30  ;;  %3843 = vmatpush3.bf16.msra.mxu1 %v3172_v28 }
 0x2ff   : > { %3845 = vmatprep.subr.bf16.mxu1 %v3173_v31 }
 0x300   : > { %3604 = vmatmul.mubr.msk.f32.gmra.mrb[12].mxu1 %vm1515_vm6, %v3135_v16 }
 0x301   : > { %3591 = vmatmul.mubr.msk.f32.gmra.mrb[8].mxu0 %vm1515_vm6, %v3123_v32 }
 0x302   : > { %3847 = vmatpush3.bf16.msra.mxu1 %v3173_v31  ;;  %3610 = vmatprep.mubr.msk.f32.mxu0 %vm1515_vm6, %v3114_v8 }
 0x303   : > { %3849 = vmatprep.subr.bf16.mxu1 %v3174_v33 }
 0x306   : > { %3851 = vmatpush3.bf16.msra.mxu1 %v3174_v33 }
 0x307   : > { %3853 = vmatprep.subr.bf16.mxu1 %v3175_v34 }
 0x30a   : > { %3855 = vmatpush3.bf16.msra.mxu1 %v3175_v34 }
 0x30b   : > { %3857 = vmatprep.subr.bf16.mxu1 %v3176_v35 }
 0x30e   : > { %3859 = vmatpush3.bf16.msra.mxu1 %v3176_v35 }
 0x30f   : > { %3861 = vmatprep.subr.bf16.mxu1 %v3177_v45 }
 0x310   : > { %v3538_v40 = vpop.f32.mrb[2].mxu0 }
 0x311   : > { %v3573_v36 = vpop.f32.mrb[2].mxu1  ;;  %v1395_v42 = vpop.f32.mrb[3].mxu0 }
 0x312   : > { %v1486_v37 = vpop.f32.mrb[3].mxu1  ;;  %v3832_v43 = vpack.c.bf16 %v3538_v40, %v1395_v42  ;;  %3863 = vmatpush3.bf16.msra.mxu1 %v3177_v45 }
 0x313   : > { %3865 = vmatprep.subr.bf16.mxu1 %v3178_v46 }
 0x314   : > { %3833 = vmatprep.subr.bf16.mxu0 %v3832_v43 }
 0x315   : > { %v3576_v38 = vpop.f32.mrb[4].mxu1  ;;  %3835 = vmatpush3.bf16.msra.mxu0 %v3832_v43 }
 0x316   : > { %v1496_v39 = vpop.f32.mrb[5].mxu1  ;;  %3867 = vmatpush3.bf16.msra.mxu1 %v3178_v46 }
 0x318   : > { %3611 = vmatmul.mubr.msk.f32.vlgmr.msra.gmra.mrb[10].mxu0 %vm1515_vm6, %v3115_v25  ;;  %v2008_v25 = vpop.trf.xlu0 }
 0x319   : > { %v3579_v41 = vpop.f32.mrb[6].mxu1  ;;  %3613 = vmatprep.mubr.msk.f32.mxu0 %vm1515_vm6, %v3118_v26 }
 0x31a   : > { %v1506_v44 = vpop.f32.mrb[7].mxu1 }
 0x31c   : > { %3614 = vmatmul.mubr.msk.f32.gmra.mrb[12].mxu0 %vm1515_vm6, %v3119_v29 }
 0x31d   : > { %3616 = vmatprep.mubr.msk.f32.mxu0 %vm1515_vm6, %v3122_v30 }
 0x320   : > { %3617 = vmatmul.mubr.msk.f32.gmra.mrb[14].mxu0 %vm1515_vm6, %v3123_v32 }
 0x321   : > { %3672 = vmatprep.mubr.msk.f32.mxu0 %vm2024_vm7, %v2008_v25 }
 0x3cb   : > { %v3599_v47 = vpop.f32.mrb[8].mxu1 }
 0x3cc   : > { %v3586_v48 = vpop.f32.mrb[4].mxu0  ;;  %v1713_v49 = vpop.f32.mrb[9].mxu1 }
 0x3cd   : > { %v1838_v50 = vmul.f32 %v3599_v47, %v3586_v48  ;;  %v1600_v51 = vpop.f32.mrb[5].mxu0 }
 0x3ce   : > { %v1837_v52 = vmul.f32 %v1713_v49, %v1600_v51 }
 0x3cf   : > { %v1844_v53 = vmul.f32 0.17677669, %v1838_v50  ;;  %v3602_v54 = vpop.f32.mrb[10].mxu1 }
 0x3d0   : > { %v1843_v55 = vmul.f32 0.17677669, %v1837_v52  ;;  %v3589_v56 = vpop.f32.mrb[6].mxu0  ;;  %v1723_v57 = vpop.f32.mrb[11].mxu1 }
 0x3d1   : > { %v3068_v58 = vclamps-f32 %v1844_v53, 5.0  ;;  %v1840_v59 = vmul.f32 %v3602_v54, %v3589_v56  ;;  %v1610_v60 = vpop.f32.mrb[7].mxu0 }
 0x3d2   : > { %v3067_v61 = vclamps-f32 %v1843_v55, 5.0  ;;  %v1839_v62 = vmul.f32 %v1723_v57, %v1610_v60 }
 0x3d3   : > { %v5205_v63 = vmul.f32 %v3573_v36, %v3068_v58  ;;  %v1846_v0 = vmul.f32 0.17677669, %v1840_v59  ;;  %v3605_v1 = vpop.f32.mrb[12].mxu1 }
 0x3d4   : > { %v5207_v2 = vmul.f32 %v3067_v61, %v1486_v37  ;;  %v1845_v3 = vmul.f32 0.17677669, %v1839_v62  ;;  %v3592_v4 = vpop.f32.mrb[8].mxu0  ;;  %v1733_v5 = vpop.f32.mrb[13].mxu1 }
 0x3d5   : > { %v3070_v6 = vclamps-f32 %v1846_v0, 5.0  ;;  %v1842_v7 = vmul.f32 %v3605_v1, %v3592_v4  ;;  %v1620_v8 = vpop.f32.mrb[9].mxu0  ;;  %v2009_v62 = vpop.trf.xlu0  ;;  %v2186_v0 = vld [vmem:[%s5005_s30 + $0x8] sm:$0xff]  ;;  %v2188_v1 = vld [vmem:[%s5005_s30 + $0x18] sm:$0xff]  ;;  %v2185_v4 = vld [vmem:[%s5005_s30] sm:$0xff] }
 0x3d6   : > { %v3069_v9 = vclamps-f32 %v1845_v3, 5.0  ;;  %v1841_v10 = vmul.f32 %v1733_v5, %v1620_v8  ;;  %3651 = vmatprep.mubr.f32.mxu1 %v5207_v2  ;;  %v3892_v3 = vpack.c.bf16 %v2188_v1, %v2186_v0  ;;  %v2187_v5 = vld [vmem:[%s5005_s30 + $0x10] sm:$0xff] }
 0x3d7   : > { %v5210_v11 = vmul.f32 %v3576_v38, %v3070_v6  ;;  %v1848_v12 = vmul.f32 0.17677669, %v1842_v7  ;;  %3652 = vmatmul.mubr.f32.vlgmr.msra.gmra.mrb[14].mxu1 %v5205_v63  ;;  %v2190_v6 = vld [vmem:[%s5005_s30 + $0x28] sm:$0xff]  ;;  %v2192_v7 = vld [vmem:[%s5005_s30 + $0x38] sm:$0xff]  ;;  %v3894_v8 = vpack.c.bf16 %v2187_v5, %v2185_v4 }
 0x3d8   : > { %v5213_v13 = vmul.f32 %v3069_v9, %v1496_v39  ;;  %v1847_v14 = vmul.f32 0.17677669, %v1841_v10  ;;  %v3896_v9 = vpack.c.bf16 %v2192_v7, %v2190_v6  ;;  %v2189_v10 = vld [vmem:[%s5005_s30 + $0x20] sm:$0xff] }
 0x3d9   : > { %v3072_v15 = vclamps-f32 %v1848_v12, 5.0  ;;  %v2191_v12 = vld [vmem:[%s5005_s30 + $0x30] sm:$0xff]  ;;  %v2431_v7 = vld [vmem:[%s5013_s2] sm:$0xff] }
 0x3da   : > { %v3071_v16 = vclamps-f32 %v1847_v14, 5.0  ;;  %3654 = vmatprep.mubr.f32.mxu1 %v5213_v13  ;;  %v2194_v14 = vld [vmem:[%s5005_s30 + $0x48] sm:$0xff] }
 0x3db   : > { %v5216_v17 = vmul.f32 %v3579_v41, %v3072_v15  ;;  %3655 = vmatmul.mubr.f32.gmra.mrb[16].mxu1 %v5210_v11  ;;  %v2196_v15 = vld [vmem:[%s5005_s30 + $0x58] sm:$0xff] }
 0x3dc   : > { %v5219_v18 = vmul.f32 %v3071_v16, %v1506_v44  ;;  %v3898_v16 = vpack.c.bf16 %v2191_v12, %v2189_v10  ;;  %v2438_v10 = vld [vmem:[%s5013_s2 + $0x38] sm:$0xff] }
 0x3de   : > { %3657 = vmatprep.mubr.f32.mxu1 %v5219_v18 }
 0x3df   : > { %3658 = vmatmul.mubr.f32.gmra.mrb[18].mxu1 %v5216_v17 }
 0x3eb   : > { %v3612_v19 = vpop.f32.mrb[10].mxu0 }
 0x3ec   : > { %v1808_v20 = vpop.f32.mrb[11].mxu0 }
 0x3ef   : > { %v3615_v21 = vpop.f32.mrb[12].mxu0 }
 0x3f0   : > { %v1818_v22 = vpop.f32.mrb[13].mxu0 }
 0x3f3   : > { %v3618_v23 = vpop.f32.mrb[14].mxu0 }
 0x3f4   : > { %v1828_v24 = vpop.f32.mrb[15].mxu0 }
 0x4aa   : > { %v3653_v26 = vpop.f32.mrb[14].mxu1 }
 0x4ab   : > { %v3074_v27 = vclamps-f32 %v3653_v26, 5.0  ;;  %v1933_v28 = vpop.f32.mrb[15].mxu1  ;;  %v2197_v26 = vld [vmem:[%s5005_s30 + $0x60] sm:$0xff] }
 0x4ac   : > { %v3073_v29 = vclamps-f32 %v1933_v28, 5.0 }
 0x4ad   : > { %v1976_v30 = vmul.f32 1.442695, %v3074_v27  ;;  %v2199_v27 = vld [vmem:[%s5005_s30 + $0x70] sm:$0xff] }
 0x4ae   : > { %v1974_v31 = vmul.f32 1.442695, %v3073_v29  ;;  %v3656_v32 = vpop.f32.mrb[16].mxu1  ;;  %v3906_v28 = vpack.c.bf16 %v2199_v27, %v2197_v26  ;;  %v2202_v29 = vld [vmem:[%s5005_s30 + $0x88] sm:$0xff]  ;;  %v2439_v27 = vld [vmem:[%s5013_s2 + $0x40] sm:$0xff] }
 0x4af   : > { %4109 = vpow2.f32 %v1976_v30  ;;  %v3076_v33 = vclamps-f32 %v3656_v32, 5.0  ;;  %v1943_v34 = vpop.f32.mrb[17].mxu1  ;;  %v2204_v30 = vld [vmem:[%s5005_s30 + $0x98] sm:$0xff]  ;;  %v2201_v32 = vld [vmem:[%s5005_s30 + $0x80] sm:$0xff] }
 0x4b0   : > { %4111 = vpow2.f32 %v1974_v31  ;;  %v3075_v35 = vclamps-f32 %v1943_v34, 5.0  ;;  %v3908_v31 = vpack.c.bf16 %v2204_v30, %v2202_v29  ;;  %v2444_v29 = vld [vmem:[%s5013_s2 + $0x68] sm:$0xff]  ;;  %v2446_v30 = vld [vmem:[%s5013_s2 + $0x78] sm:$0xff] }
 0x4b1   : > { %v1980_v36 = vmul.f32 1.442695, %v3076_v33  ;;  %v2203_v33 = vld [vmem:[%s5005_s30 + $0x90] sm:$0xff] }
 0x4b2   : > { %v1978_v37 = vmul.f32 1.442695, %v3075_v35  ;;  %v3659_v38 = vpop.f32.mrb[18].mxu1  ;;  %v3910_v34 = vpack.c.bf16 %v2203_v33, %v2201_v32  ;;  %v2206_v35 = vld [vmem:[%s5005_s30 + $0xa8] sm:$0xff]  ;;  %v3968_v32 = vpack.c.bf16 %v2446_v30, %v2444_v29  ;;  %v2443_v33 = vld [vmem:[%s5013_s2 + $0x60] sm:$0xff] }
 0x4b3   : > { %4113 = vpow2.f32 %v1980_v36  ;;  %v3078_v39 = vclamps-f32 %v3659_v38, 5.0  ;;  %v1953_v40 = vpop.f32.mrb[19].mxu1  ;;  %v2208_v36 = vld [vmem:[%s5005_s30 + $0xb8] sm:$0xff]  ;;  %v2205_v38 = vld [vmem:[%s5005_s30 + $0xa0] sm:$0xff]  ;;  %v2335_v30 = vld [vmem:[%s5007_s0 + $0x68] sm:$0xff] }
 0x4b4   : > { %4115 = vpow2.f32 %v1978_v37  ;;  %v3077_v41 = vclamps-f32 %v1953_v40, 5.0  ;;  %v3912_v37 = vpack.c.bf16 %v2208_v36, %v2206_v35  ;;  %v2448_v35 = vld [vmem:[%s5013_s2 + $0x88] sm:$0xff]  ;;  %v2450_v36 = vld [vmem:[%s5013_s2 + $0x98] sm:$0xff]  ;;  %v2334_v29 = vld [vmem:[%s5007_s0 + $0x60] sm:$0xff] }
 0x4b5   : > { %v1984_v42 = vmul.f32 1.442695, %v3078_v39  ;;  %v2207_v39 = vld [vmem:[%s5005_s30 + $0xb0] sm:$0xff] }
 0x4b6   : > { %v1982_v43 = vmul.f32 1.442695, %v3077_v41  ;;  %v3914_v40 = vpack.c.bf16 %v2207_v39, %v2205_v38  ;;  %v2210_v41 = vld [vmem:[%s5005_s30 + $0xc8] sm:$0xff]  ;;  %v3972_v38 = vpack.c.bf16 %v2450_v36, %v2448_v35  ;;  %v2447_v39 = vld [vmem:[%s5013_s2 + $0x80] sm:$0xff]  ;;  %v2336_v35 = vld [vmem:[%s5007_s0 + $0x70] sm:$0xff] }
 0x4b7   : > { %4117 = vpow2.f32 %v1984_v42  ;;  %v2212_v42 = vld [vmem:[%s5005_s30 + $0xd8] sm:$0xff] }
 0x4b8   : > { %4119 = vpow2.f32 %v1982_v43  ;;  %v2209_v43 = vld [vmem:[%s5005_s30 + $0xc0] sm:$0xff]  ;;  %v2337_v36 = vld [vmem:[%s5007_s0 + $0x78] sm:$0xff] }
 0x4b9   : > { %v4110_v44 = vpop.eup %4109 }
 0x4ba   : > { %v4112_v45 = vpop.eup %4111  ;;  %v1987_v46 = vmul.f32 %v4110_v44, %v3612_v19  ;;  %v3900_v19 = vpack.c.bf16 %v2196_v15, %v2194_v14 }
 0x4bb   : > { %v1986_v47 = vmul.f32 %v4112_v45, %v1808_v20  ;;  %v3880_v48 = vpack.c.bf16 %v4110_v44, %v4112_v45  ;;  %v2193_v20 = vld [vmem:[%s5005_s30 + $0x40] sm:$0xff]  ;;  %v3916_v44 = vpack.c.bf16 %v2212_v42, %v2210_v41  ;;  %v2211_v45 = vld [vmem:[%s5005_s30 + $0xd0] sm:$0xff]  ;;  %v2452_v41 = vld [vmem:[%s5013_s2 + $0xa8] sm:$0xff] }
 0x4bc   : > { %v2454_v42 = vld [vmem:[%s5013_s2 + $0xb8] sm:$0xff] }
 0x4bd   : > { %v4114_v49 = vpop.eup %4113  ;;  %v3868_v50 = vpack.c.bf16 %v1987_v46, %v1986_v47  ;;  %v2214_v46 = vld [vmem:[%s5005_s30 + $0xe8] sm:$0xff]  ;;  %v2216_v47 = vld [vmem:[%s5005_s30 + $0xf8] sm:$0xff] }
 0x4be   : > { %v4116_v51 = vpop.eup %4115  ;;  %v1989_v52 = vmul.f32 %v4114_v49, %v3615_v21  ;;  %v2195_v21 = vld [vmem:[%s5005_s30 + $0x50] sm:$0xff] }
 0x4bf   : > { %v1988_v53 = vmul.f32 %v4116_v51, %v1818_v22  ;;  %3869 = vmatprep.subr.bf16.mxu0 %v3868_v50  ;;  %v3884_v54 = vpack.c.bf16 %v4114_v49, %v4116_v51  ;;  %v2198_v22 = vld [vmem:[%s5005_s30 + $0x68] sm:$0xff]  ;;  %v3918_v49 = vpack.c.bf16 %v2211_v45, %v2209_v43  ;;  %v2213_v51 = vld [vmem:[%s5005_s30 + $0xe0] sm:$0xff] }
 0x4c0   : > { %3871 = vmatpush3.bf16.msra.mxu0 %v3868_v50  ;;  %v3920_v50 = vpack.c.bf16 %v2216_v47, %v2214_v46  ;;  %v2451_v45 = vld [vmem:[%s5013_s2 + $0xa0] sm:$0xff]  ;;  %v2453_v46 = vld [vmem:[%s5013_s2 + $0xb0] sm:$0xff]  ;;  %v2456_v47 = vld [vmem:[%s5013_s2 + $0xc8] sm:$0xff] }
 0x4c1   : > { %v4118_v55 = vpop.eup %4117  ;;  %v3872_v56 = vpack.c.bf16 %v1989_v52, %v1988_v53  ;;  %v2215_v52 = vld [vmem:[%s5005_s30 + $0xf0] sm:$0xff]  ;;  %v2432_v53 = vld [vmem:[%s5013_s2 + $0x8] sm:$0xff] }
 0x4c2   : > { %v4120_v57 = vpop.eup %4119  ;;  %v1991_v58 = vmul.f32 %v4118_v55, %v3618_v23  ;;  %v2200_v23 = vld [vmem:[%s5005_s30 + $0x78] sm:$0xff]  ;;  %s5538_s30 = sld [smem:[#allocation26_spill]] }
 0x4c3   : > { %v1990_v59 = vmul.f32 %v4120_v57, %v1828_v24  ;;  %3873 = vmatprep.subr.bf16.mxu0 %v3872_v56  ;;  %v3888_v60 = vpack.c.bf16 %v4118_v55, %v4120_v57  ;;  %v3902_v24 = vpack.c.bf16 %v2195_v21, %v2193_v20  ;;  %v3922_v55 = vpack.c.bf16 %v2215_v52, %v2213_v51  ;;  %v2338_v57 = vld [vmem:[%s5007_s0 + $0x80] sm:$0xff] }
 0x4c4   : > { %3875 = vmatpush3.bf16.msra.mxu0 %v3872_v56  ;;  %v2435_v21 = vld [vmem:[%s5013_s2 + $0x20] sm:$0xff] }
 0x4c5   : > { %v3876_v61 = vpack.c.bf16 %v1991_v58, %v1990_v59  ;;  %v2339_v58 = vld [vmem:[%s5007_s0 + $0x88] sm:$0xff]  ;;  %v2322_v59 = vld [vmem:[%s5007_s0] sm:$0xff] }
 0x4c6   : > { %v2455_v52 = vld [vmem:[%s5013_s2 + $0xc0] sm:$0xff] }
 0x4c7   : > { %3877 = vmatprep.subr.bf16.mxu0 %v3876_v61 }
 0x4c8   : > { %3879 = vmatpush3.bf16.msra.mxu0 %v3876_v61  ;;  %v2323_v61 = vld [vmem:[%s5007_s0 + $0x8] sm:$0xff]  ;;  %p3099_p4 = scmp.ne.s32.totalorder %s5538_s30, 2 }
 0x4c9   : > { %3881 = vmatprep.subr.bf16.mxu0 %v3880_v48 }
 0x4cb   : > { %3673 = vmatmul.mubr.msk.f32.vlgmr.msra.gmra.mrb[16].mxu0 %vm2024_vm7, %v2009_v62 }
 0x4cc   : > { %3883 = vmatpush3.bf16.msra.mxu0 %v3880_v48  ;;  %3687 = vmatprep.mubr.msk.f32.mxu0 %vm2024_vm7, %v2008_v25  ;;  %v3904_v25 = vpack.c.bf16 %v2200_v23, %v2198_v22  ;;  %v4524_v48 = vmov 0.0   ;;  %v2437_v22 = vld [vmem:[%s5013_s2 + $0x30] sm:$0xff]  ;;  %v2440_v23 = vld [vmem:[%s5013_s2 + $0x48] sm:$0xff] }
 0x4cd   : > { %3885 = vmatprep.subr.bf16.mxu0 %v3884_v54 }
 0x4d0   : > { %3887 = vmatpush3.bf16.msra.mxu0 %v3884_v54  ;;  %v2434_v54 = vld [vmem:[%s5013_s2 + $0x18] sm:$0xff] }
 0x4d1   : > { %3889 = vmatprep.subr.bf16.mxu0 %v3888_v60  ;;  %v3956_v56 = vpack.c.bf16 %v2434_v54, %v2432_v53  ;;  %v2457_v53 = vld [vmem:[%s5013_s2 + $0xd0] sm:$0xff]  ;;  %v2460_v54 = vld [vmem:[%s5013_s2 + $0xe8] sm:$0xff] }
 0x4d4   : > { %3891 = vmatpush3.bf16.msra.mxu0 %v3888_v60  ;;  %v3924_v60 = vpack.c.bf16 %v2339_v58, %v2338_v57  ;;  %v2459_v58 = vld [vmem:[%s5013_s2 + $0xe0] sm:$0xff] }
 0x4d5   : > { %3893 = vmatprep.subr.bf16.mxu0 %v3892_v3 }
 0x4d6   : > { %3925 = vmatprep.subr.bf16.mxu1 %v3924_v60 }
 0x4d7   : > { %3688 = vmatmul.mubr.msk.f32.vlgmr.msra.gmra.mrb[18].mxu0 %vm2024_vm7, %v2009_v62  ;;  %v3926_v62 = vpack.c.bf16 %v2323_v61, %v2322_v59  ;;  %v2461_v59 = vld [vmem:[%s5013_s2 + $0xf0] sm:$0xff] }
 0x4d8   : > { %3895 = vmatpush1.bf16.msra.mxu0 %v3894_v8  ;;  %2281 = vmatprep.mubr.f32.mxu0 %v4524_v48  ;;  %v2433_v8 = vld [vmem:[%s5013_s2 + $0x10] sm:$0xff]  ;;  %v3986_v60 = vpack.c.bf16 %v2461_v59, %v2459_v58  ;;  %v2648_v58 = vld [vmem:[%s5015_s6] sm:$0xff]  ;;  %v2649_v59 = vld [vmem:[%s5015_s6 + $0x8] sm:$0xff] }
 0x4d9   : > { %3897 = vmatprep.subr.bf16.mxu0 %v3896_v9  ;;  %3927 = vmatpush3.bf16.msra.mxu1 %v3926_v62  ;;  %v2436_v9 = vld [vmem:[%s5013_s2 + $0x28] sm:$0xff]  ;;  %v3958_v15 = vpack.c.bf16 %v2433_v8, %v2431_v7  ;;  %v2324_v61 = vld [vmem:[%s5007_s0 + $0x10] sm:$0xff]  ;;  %v2325_v62 = vld [vmem:[%s5007_s0 + $0x18] sm:$0xff] }
 0x4da   : > { %v3960_v20 = vpack.c.bf16 %v2438_v10, %v2436_v9  ;;  %v2328_v7 = vld [vmem:[%s5007_s0 + $0x30] sm:$0xff]  ;;  %v2329_v8 = vld [vmem:[%s5007_s0 + $0x38] sm:$0xff]  ;;  %v2346_v10 = vld [vmem:[%s5007_s0 + $0xc0] sm:$0xff] }
 0x4db   : > { %v3938_v9 = vpack.c.bf16 %v2329_v8, %v2328_v7 }
 0x4dc   : > { %3899 = vmatpush1.bf16.msra.mxu0 %v3898_v16 }
 0x4dd   : > { %3901 = vmatprep.subr.bf16.mxu0 %v3900_v19 }
 0x4e0   : > { %3903 = vmatpush1.bf16.msra.mxu0 %v3902_v24  ;;  %v2442_v24 = vld [vmem:[%s5013_s2 + $0x58] sm:$0xff] }
 0x4e1   : > { %3905 = vmatprep.subr.bf16.mxu0 %v3904_v25  ;;  %v3962_v25 = vpack.c.bf16 %v2437_v22, %v2435_v21  ;;  %v3964_v26 = vpack.c.bf16 %v2442_v24, %v2440_v23  ;;  %v2349_v21 = vld [vmem:[%s5007_s0 + $0xd8] sm:$0xff]  ;;  %v2332_v23 = vld [vmem:[%s5007_s0 + $0x50] sm:$0xff] }
 0x4e2   : > { %v2333_v24 = vld [vmem:[%s5007_s0 + $0x58] sm:$0xff] }
 0x4e4   : > { %3907 = vmatpush1.bf16.msra.mxu0 %v3906_v28  ;;  %v2441_v28 = vld [vmem:[%s5013_s2 + $0x50] sm:$0xff] }
 0x4e5   : > { %3909 = vmatprep.subr.bf16.mxu0 %v3908_v31  ;;  %v3966_v31 = vpack.c.bf16 %v2441_v28, %v2439_v27  ;;  %v2351_v27 = vld [vmem:[%s5007_s0 + $0xe8] sm:$0xff] }
 0x4e8   : > { %3911 = vmatpush1.bf16.msra.mxu0 %v3910_v34  ;;  %v2445_v34 = vld [vmem:[%s5013_s2 + $0x70] sm:$0xff] }
 0x4e9   : > { %3913 = vmatprep.subr.bf16.mxu0 %v3912_v37  ;;  %v3970_v37 = vpack.c.bf16 %v2445_v34, %v2443_v33  ;;  %v2353_v33 = vld [vmem:[%s5007_s0 + $0xf8] sm:$0xff] }
 0x4ec   : > { %3915 = vmatpush1.bf16.msra.mxu0 %v3914_v40  ;;  %v2449_v40 = vld [vmem:[%s5013_s2 + $0x90] sm:$0xff] }
 0x4ed   : > { %3917 = vmatprep.subr.bf16.mxu0 %v3916_v44  ;;  %v3974_v43 = vpack.c.bf16 %v2449_v40, %v2447_v39  ;;  %v3976_v44 = vpack.c.bf16 %v2454_v42, %v2452_v41  ;;  %v2665_v39 = vld [vmem:[%s5015_s6 + $0x88] sm:$0xff] }
 0x4f0   : > { %3919 = vmatpush1.bf16.msra.mxu0 %v3918_v49  ;;  %v2458_v49 = vld [vmem:[%s5013_s2 + $0xd8] sm:$0xff] }
 0x4f1   : > { %3921 = vmatprep.subr.bf16.mxu0 %v3920_v50  ;;  %v3978_v50 = vpack.c.bf16 %v2453_v46, %v2451_v45  ;;  %v3980_v51 = vpack.c.bf16 %v2458_v49, %v2456_v47 }
 0x4f4   : > { %3923 = vmatpush1.bf16.msra.mxu0 %v3922_v55  ;;  %v2462_v55 = vld [vmem:[%s5013_s2 + $0xf8] sm:$0xff] }
 0x4f5   : > { %3957 = vmatprep.subr.bf16.mxu0 %v3956_v56  ;;  %v3982_v56 = vpack.c.bf16 %v2457_v53, %v2455_v52  ;;  %v3984_v57 = vpack.c.bf16 %v2462_v55, %v2460_v54 }
 0x59e   : > { %v3674_v0 = vpop.f32.mrb[16].mxu0 }
 0x59f   : > { %v2097_v1 = vpop.f32.mrb[17].mxu0 }
 0x5aa   : > { %v3689_v3 = vpop.f32.mrb[18].mxu0 }
 0x5ab   : > { %v2178_v4 = vadd.f32 1e-06, %v3689_v3  ;;  %v2172_v5 = vpop.f32.mrb[19].mxu0 }
 0x5ac   : > { %v2173_v6 = vadd.f32 1e-06, %v2172_v5  ;;  %v2345_v5 = vld [vmem:[%s5007_s0 + $0xb8] sm:$0xff] }
 0x5ad   : > { %4121 = vrcp.f32 %v2178_v4  ;;  %v2344_v4 = vld [vmem:[%s5007_s0 + $0xb0] sm:$0xff] }
 0x5ae   : > { %4123 = vrcp.f32 %v2173_v6  ;;  %v3936_v6 = vpack.c.bf16 %v2345_v5, %v2344_v4 }
 0x5b7   : > { %v4122_v12 = vpop.eup %4121 }
 0x5b8   : > { %v4124_v14 = vpop.eup %4123  ;;  %v2184_v16 = vmul.f32 %v4122_v12, %v3674_v0  ;;  %v2342_v0 = vld [vmem:[%s5007_s0 + $0xa0] sm:$0xff]  ;;  %v2347_v12 = vld [vmem:[%s5007_s0 + $0xc8] sm:$0xff] }
 0x5b9   : > { %v2182_v19 = vmul.f32 %v4124_v14, %v2097_v1  ;;  %v2343_v1 = vld [vmem:[%s5007_s0 + $0xa8] sm:$0xff]  ;;  %v3940_v14 = vpack.c.bf16 %v2347_v12, %v2346_v10 }
 0x5bb   : > { %2282 = vmatmul.mubr.f32.vlgmr.msra.gmra.mrb[20].mxu0 %v2182_v19 }
 0x5bc   : > { %3959 = vmatpush1.bf16.msra.mxu0 %v3958_v15  ;;  %2287 = vmatprep.mubr.f32.mxu0 %v4524_v48  ;;  %v2330_v15 = vld [vmem:[%s5007_s0 + $0x40] sm:$0xff] }
 0x5bd   : > { %3961 = vmatprep.subr.bf16.mxu0 %v3960_v20  ;;  %v2348_v20 = vld [vmem:[%s5007_s0 + $0xd0] sm:$0xff] }
 0x5be   : > { %v3944_v22 = vpack.c.bf16 %v2349_v21, %v2348_v20  ;;  %v2671_v20 = vld [vmem:[%s5015_s6 + $0xb8] sm:$0xff] }
 0x5bf   : > { %2288 = vmatmul.mubr.f32.gmra.mrb[22].mxu0 %v2184_v16  ;;  %v2331_v16 = vld [vmem:[%s5007_s0 + $0x48] sm:$0xff] }
 0x5c0   : > { %3963 = vmatpush1.bf16.msra.mxu0 %v3962_v25  ;;  %2527 = vmatprep.mubr.f32.mxu0 %v4524_v48  ;;  %v3942_v19 = vpack.c.bf16 %v2331_v16, %v2330_v15  ;;  %v3946_v25 = vpack.c.bf16 %v2333_v24, %v2332_v23  ;;  %v2653_v15 = vld [vmem:[%s5015_s6 + $0x28] sm:$0xff] }
 0x5c1   : > { %3965 = vmatprep.subr.bf16.mxu0 %v3964_v26  ;;  %v2350_v26 = vld [vmem:[%s5007_s0 + $0xe0] sm:$0xff] }
 0x5c2   : > { %v3948_v28 = vpack.c.bf16 %v2351_v27, %v2350_v26  ;;  %v2654_v26 = vld [vmem:[%s5015_s6 + $0x30] sm:$0xff]  ;;  %v2655_v27 = vld [vmem:[%s5015_s6 + $0x38] sm:$0xff] }
 0x5c4   : > { %3967 = vmatpush1.bf16.msra.mxu0 %v3966_v31  ;;  %v3950_v31 = vpack.c.bf16 %v2335_v30, %v2334_v29  ;;  %v2672_v29 = vld [vmem:[%s5015_s6 + $0xc0] sm:$0xff]  ;;  %v2673_v30 = vld [vmem:[%s5015_s6 + $0xc8] sm:$0xff] }
 0x5c5   : > { %3969 = vmatprep.subr.bf16.mxu0 %v3968_v32  ;;  %v2352_v32 = vld [vmem:[%s5007_s0 + $0xf0] sm:$0xff] }
 0x5c6   : > { %v3952_v34 = vpack.c.bf16 %v2353_v33, %v2352_v32  ;;  %v4002_v32 = vpack.c.bf16 %v2655_v27, %v2654_v26 }
 0x5c8   : > { %3971 = vmatpush1.bf16.msra.mxu0 %v3970_v37  ;;  %v3954_v37 = vpack.c.bf16 %v2337_v36, %v2336_v35  ;;  %v4004_v35 = vpack.c.bf16 %v2673_v30, %v2672_v29  ;;  %v2656_v36 = vld [vmem:[%s5015_s6 + $0x40] sm:$0xff] }
 0x5c9   : > { %3973 = vmatprep.subr.bf16.mxu0 %v3972_v38  ;;  %v2664_v38 = vld [vmem:[%s5015_s6 + $0x80] sm:$0xff] }
 0x5ca   : > { %v3988_v40 = vpack.c.bf16 %v2665_v39, %v2664_v38  ;;  %v2674_v39 = vld [vmem:[%s5015_s6 + $0xd0] sm:$0xff] }
 0x5cc   : > { %3975 = vmatpush1.bf16.msra.mxu0 %v3974_v43 }
 0x5cd   : > { %3977 = vmatprep.subr.bf16.mxu0 %v3976_v44 }
 0x5d0   : > { %3979 = vmatpush1.bf16.msra.mxu0 %v3978_v50 }
 0x5d1   : > { %3981 = vmatprep.subr.bf16.mxu0 %v3980_v51 }
 0x5d4   : > { %3983 = vmatpush1.bf16.msra.mxu0 %v3982_v56 }
 0x5d5   : > { %3985 = vmatprep.subr.bf16.mxu0 %v3984_v57 }
 0x5d8   : > { %3987 = vmatpush1.bf16.msra.mxu0 %v3986_v60 }
 0x5db   : > { %2528 = vmatmul.mubr.f32.vlgmr.msra.gmra.mrb[24].mxu0 %v5207_v2  ;;  %v2341_v2 = vld [vmem:[%s5007_s0 + $0x98] sm:$0xff] }
 0x5dc   : > { %2533 = vmatprep.mubr.f32.mxu0 %v4524_v48 }
 0x5df   : > { %2534 = vmatmul.mubr.f32.gmra.mrb[26].mxu0 %v5205_v63  ;;  %v2340_v63 = vld [vmem:[%s5007_s0 + $0x90] sm:$0xff] }
 0x5e0   : > { %2539 = vmatprep.mubr.f32.mxu0 %v4524_v48 }
 0x5e3   : > { %2540 = vmatmul.mubr.f32.gmra.mrb[28].mxu0 %v5213_v13  ;;  %v3928_v13 = vpack.c.bf16 %v2341_v2, %v2340_v63  ;;  %v2666_v63 = vld [vmem:[%s5015_s6 + $0x90] sm:$0xff]  ;;  %v2667_v2 = vld [vmem:[%s5015_s6 + $0x98] sm:$0xff] }
 0x5e4   : > { %2545 = vmatprep.mubr.f32.mxu0 %v4524_v48 }
 0x5e5   : > { %3929 = vmatprep.subr.bf16.mxu1 %v3928_v13 }
 0x5e7   : > { %2546 = vmatmul.mubr.f32.gmra.mrb[30].mxu0 %v5210_v11  ;;  %v3930_v11 = vpack.c.bf16 %v2325_v62, %v2324_v61  ;;  %v3990_v62 = vpack.c.bf16 %v2649_v59, %v2648_v58 }
 0x5e8   : > { %2551 = vmatprep.mubr.f32.mxu0 %v4524_v48 }
 0x5e9   : > { %3931 = vmatpush3.bf16.msra.mxu1 %v3930_v11 }
 0x5eb   : > { %2552 = vmatmul.mubr.f32.gmra.mrb[32].mxu0 %v5219_v18  ;;  %v3932_v18 = vpack.c.bf16 %v2343_v1, %v2342_v0  ;;  %v3992_v0 = vpack.c.bf16 %v2667_v2, %v2666_v63  ;;  %v2650_v1 = vld [vmem:[%s5015_s6 + $0x10] sm:$0xff]  ;;  %v2660_v2 = vld [vmem:[%s5015_s6 + $0x60] sm:$0xff] }
 0x5ec   : > { %2557 = vmatprep.mubr.f32.mxu0 %v4524_v48  ;;  %v2326_v48 = vld [vmem:[%s5007_s0 + $0x20] sm:$0xff] }
 0x5ed   : > { %3933 = vmatprep.subr.bf16.mxu1 %v3932_v18  ;;  %v2651_v18 = vld [vmem:[%s5015_s6 + $0x18] sm:$0xff] }
 0x5ee   : > { %v3994_v7 = vpack.c.bf16 %v2651_v18, %v2650_v1  ;;  %v2679_v1 = vld [vmem:[%s5015_s6 + $0xf8] sm:$0xff] }
 0x5ef   : > { %2558 = vmatmul.mubr.f32.gmra.mrb[34].mxu0 %v5216_v17  ;;  %v2327_v17 = vld [vmem:[%s5007_s0 + $0x28] sm:$0xff] }
 0x5f0   : > { %v3934_v3 = vpack.c.bf16 %v2327_v17, %v2326_v48  ;;  %v2668_v17 = vld [vmem:[%s5015_s6 + $0xa0] sm:$0xff] }
 0x5f2   : > { %3935 = vmatpush3.bf16.msra.mxu1 %v3934_v3  ;;  %v2669_v3 = vld [vmem:[%s5015_s6 + $0xa8] sm:$0xff] }
 0x5f3   : > { %3937 = vmatprep.subr.bf16.mxu1 %v3936_v6  ;;  %v3996_v12 = vpack.c.bf16 %v2669_v3, %v2668_v17 }
 0x5f6   : > { %3939 = vmatpush3.bf16.msra.mxu1 %v3938_v9 }
 0x5f7   : > { %3941 = vmatprep.subr.bf16.mxu1 %v3940_v14  ;;  %v2652_v14 = vld [vmem:[%s5015_s6 + $0x20] sm:$0xff] }
 0x5fa   : > { %3943 = vmatpush3.bf16.msra.mxu1 %v3942_v19  ;;  %v2670_v19 = vld [vmem:[%s5015_s6 + $0xb0] sm:$0xff] }
 0x5fb   : > { %3945 = vmatprep.subr.bf16.mxu1 %v3944_v22  ;;  %v3998_v22 = vpack.c.bf16 %v2653_v15, %v2652_v14 }
 0x5fe   : > { %3947 = vmatpush3.bf16.msra.mxu1 %v3946_v25  ;;  %v4000_v25 = vpack.c.bf16 %v2671_v20, %v2670_v19 }
 0x5ff   : > { %3949 = vmatprep.subr.bf16.mxu1 %v3948_v28 }
 0x602   : > { %3951 = vmatpush3.bf16.msra.mxu1 %v3950_v31 }
 0x603   : > { %3953 = vmatprep.subr.bf16.mxu1 %v3952_v34 }
 0x606   : > { %3955 = vmatpush3.bf16.msra.mxu1 %v3954_v37  ;;  %v2657_v37 = vld [vmem:[%s5015_s6 + $0x48] sm:$0xff] }
 0x607   : > { %3989 = vmatprep.subr.bf16.mxu1 %v3988_v40  ;;  %v2675_v40 = vld [vmem:[%s5015_s6 + $0xd8] sm:$0xff] }
 0x68e   : > { %v2283_v41 = vpop.f32.mrb[20].mxu0 }
 0x68f   : > { %v3083_v42 = vmul.f32 -1.442695, %v2283_v41  ;;  %v2285_v43 = vpop.f32.mrb[21].mxu0 }
 0x690   : > { %v3084_v44 = vmul.f32 -1.442695, %v2285_v43 }
 0x691   : > { %4125 = vpow2.f32 %v3083_v42  ;;  %v4006_v42 = vpack.c.bf16 %v2657_v37, %v2656_v36 }
 0x692   : > { %4127 = vpow2.f32 %v3084_v44  ;;  %v2289_v45 = vpop.f32.mrb[22].mxu0 }
 0x693   : > { %v3085_v46 = vmul.f32 -1.442695, %v2289_v45  ;;  %v2291_v47 = vpop.f32.mrb[23].mxu0 }
 0x694   : > { %v3086_v49 = vmul.f32 -1.442695, %v2291_v47 }
 0x695   : > { %4129 = vpow2.f32 %v3085_v46  ;;  %v4008_v46 = vpack.c.bf16 %v2675_v40, %v2674_v39 }
 0x696   : > { %4131 = vpow2.f32 %v3086_v49  ;;  %v2659_v49 = vld [vmem:[%s5015_s6 + $0x58] sm:$0xff] }
 0x69b   : > { %v4126_v50 = vpop.eup %4125 }
 0x69c   : > { %v4128_v51 = vpop.eup %4127  ;;  %v2306_v52 = vadd.f32 1.0, %v4126_v50 }
 0x69d   : > { %v2307_v53 = vadd.f32 1.0, %v4128_v51 }
 0x69e   : > { %4133 = vrcp.f32 %v2306_v52 }
 0x69f   : > { %v4130_v54 = vpop.eup %4129  ;;  %4135 = vrcp.f32 %v2307_v53  ;;  %v2676_v53 = vld [vmem:[%s5015_s6 + $0xe0] sm:$0xff] }
 0x6a0   : > { %v4132_v55 = vpop.eup %4131  ;;  %v2308_v56 = vadd.f32 1.0, %v4130_v54  ;;  %v2677_v54 = vld [vmem:[%s5015_s6 + $0xe8] sm:$0xff] }
 0x6a1   : > { %v2309_v57 = vadd.f32 1.0, %v4132_v55  ;;  %v4012_v63 = vpack.c.bf16 %v2677_v54, %v2676_v53 }
 0x6a2   : > { %4137 = vrcp.f32 %v2308_v56 }
 0x6a3   : > { %4139 = vrcp.f32 %v2309_v57 }
 0x6a8   : > { %v4134_v60 = vpop.eup %4133 }
 0x6a9   : > { %v4136_v13 = vpop.eup %4135  ;;  %v2318_v11 = vmul.f32 %v4134_v60, %v2283_v41 }
 0x6aa   : > { %v2319_v61 = vmul.f32 %v4136_v13, %v2285_v43  ;;  %v2661_v13 = vld [vmem:[%s5015_s6 + $0x68] sm:$0xff] }
 0x6ab   : > { %v4014_v17 = vpack.c.bf16 %v2661_v13, %v2660_v2 }
 0x6ac   : > { %v4138_v48 = vpop.eup %4137  ;;  %2418 = vmatprep.mubr.f32.mxu1 %v2319_v61 }
 0x6ad   : > { %v4140_v4 = vpop.eup %4139  ;;  %2419 = vmatmul.mubr.f32.vlgmr.msra.gmra.mrb[20].mxu1 %v2318_v11  ;;  %v2320_v8 = vmul.f32 %v4138_v48, %v2289_v45 }
 0x6ae   : > { %v2321_v5 = vmul.f32 %v4140_v4, %v2291_v47  ;;  %v5347_v6 = vpop.f32.mrb[24].mxu0  ;;  %3991 = vmatpush3.bf16.msra.mxu1 %v3990_v62  ;;  %v2658_v47 = vld [vmem:[%s5015_s6 + $0x50] sm:$0xff] }
 0x6af   : > { %v3087_v9 = vmul.f32 -1.442695, %v5347_v6  ;;  %v5350_v10 = vpop.f32.mrb[25].mxu0  ;;  %3993 = vmatprep.subr.bf16.mxu1 %v3992_v0  ;;  %v4010_v57 = vpack.c.bf16 %v2659_v49, %v2658_v47  ;;  %v2678_v0 = vld [vmem:[%s5015_s6 + $0xf0] sm:$0xff] }
 0x6b0   : > { %v3088_v16 = vmul.f32 -1.442695, %v5350_v10  ;;  %2423 = vmatprep.mubr.f32.mxu1 %v2321_v5 }
 0x6b1   : > { %4141 = vpow2.f32 %v3087_v9  ;;  %2424 = vmatmul.mubr.f32.gmra.mrb[22].mxu1 %v2320_v8  ;;  %v2662_v8 = vld [vmem:[%s5015_s6 + $0x70] sm:$0xff]  ;;  %v2663_v9 = vld [vmem:[%s5015_s6 + $0x78] sm:$0xff] }
 0x6b2   : > { %4143 = vpow2.f32 %v3088_v16  ;;  %v5357_v21 = vpop.f32.mrb[26].mxu0  ;;  %3995 = vmatpush3.bf16.msra.mxu1 %v3994_v7  ;;  %v4016_v7 = vpack.c.bf16 %v2679_v1, %v2678_v0  ;;  %v4018_v19 = vpack.c.bf16 %v2663_v9, %v2662_v8 }
 0x6b3   : > { %v3089_v23 = vmul.f32 -1.442695, %v5357_v21  ;;  %v5360_v24 = vpop.f32.mrb[27].mxu0  ;;  %3997 = vmatprep.subr.bf16.mxu1 %v3996_v12 }
 0x6b4   : > { %v3090_v28 = vmul.f32 -1.442695, %v5360_v24 }
 0x6b5   : > { %4145 = vpow2.f32 %v3089_v23 }
 0x6b6   : > { %4147 = vpow2.f32 %v3090_v28  ;;  %v5367_v31 = vpop.f32.mrb[28].mxu0  ;;  %3999 = vmatpush3.bf16.msra.mxu1 %v3998_v22 }
 0x6b7   : > { %v3091_v33 = vmul.f32 -1.442695, %v5367_v31  ;;  %v5370_v34 = vpop.f32.mrb[29].mxu0  ;;  %4001 = vmatprep.subr.bf16.mxu1 %v4000_v25 }
 0x6b8   : > { %v3092_v38 = vmul.f32 -1.442695, %v5370_v34 }
 0x6b9   : > { %4149 = vpow2.f32 %v3091_v33 }
 0x6ba   : > { %4151 = vpow2.f32 %v3092_v38  ;;  %v5377_v41 = vpop.f32.mrb[30].mxu0  ;;  %4003 = vmatpush3.bf16.msra.mxu1 %v4002_v32 }
 0x6bb   : > { %v4142_v43 = vpop.eup %4141  ;;  %v3093_v44 = vmul.f32 -1.442695, %v5377_v41  ;;  %v5380_v45 = vpop.f32.mrb[31].mxu0  ;;  %4005 = vmatprep.subr.bf16.mxu1 %v4004_v35 }
 0x6bc   : > { %v4144_v50 = vpop.eup %4143  ;;  %v2600_v51 = vadd.f32 1.0, %v4142_v43  ;;  %v3094_v52 = vmul.f32 -1.442695, %v5380_v45 }
 0x6bd   : > { %v2601_v55 = vadd.f32 1.0, %v4144_v50  ;;  %4153 = vpow2.f32 %v3093_v44 }
 0x6be   : > { %4155 = vrcp.f32 %v2600_v51  ;;  %v5387_v56 = vpop.f32.mrb[32].mxu0  ;;  %4007 = vmatpush3.bf16.msra.mxu1 %v4006_v42 }
 0x6bf   : > { %v4146_v58 = vpop.eup %4145  ;;  %4157 = vrcp.f32 %v2601_v55  ;;  %v3095_v59 = vmul.f32 -1.442695, %v5387_v56  ;;  %v5390_v60 = vpop.f32.mrb[33].mxu0  ;;  %4009 = vmatprep.subr.bf16.mxu1 %v4008_v46 }
 0x6c0   : > { %v4148_v61 = vpop.eup %4147  ;;  %v2602_v62 = vadd.f32 1.0, %v4146_v58  ;;  %4159 = vpow2.f32 %v3094_v52  ;;  %v3096_v11 = vmul.f32 -1.442695, %v5390_v60 }
 0x6c1   : > { %v2603_v18 = vadd.f32 1.0, %v4148_v61  ;;  %4161 = vpow2.f32 %v3095_v59 }
 0x6c2   : > { %4163 = vrcp.f32 %v2602_v62  ;;  %v5397_v48 = vpop.f32.mrb[34].mxu0  ;;  %4011 = vmatpush3.bf16.msra.mxu1 %v4010_v57 }
 0x6c3   : > { %v4150_v3 = vpop.eup %4149  ;;  %4165 = vrcp.f32 %v2603_v18  ;;  %v3097_v4 = vmul.f32 -1.442695, %v5397_v48  ;;  %v5400_v5 = vpop.f32.mrb[35].mxu0  ;;  %4013 = vmatprep.subr.bf16.mxu1 %v4012_v63 }
 0x6c4   : > { %v4152_v12 = vpop.eup %4151  ;;  %v2604_v14 = vadd.f32 1.0, %v4150_v3  ;;  %4167 = vpow2.f32 %v3096_v11  ;;  %v3098_v15 = vmul.f32 -1.442695, %v5400_v5 }
 0x6c5   : > { %v2605_v16 = vadd.f32 1.0, %v4152_v12  ;;  %4169 = vpow2.f32 %v3097_v4 }
 0x6c6   : > { %4171 = vrcp.f32 %v2604_v14  ;;  %4015 = vmatpush3.bf16.msra.mxu1 %v4014_v17 }
 0x6c7   : > { %v4154_v20 = vpop.eup %4153  ;;  %4173 = vrcp.f32 %v2605_v16  ;;  %4017 = vmatprep.subr.bf16.mxu1 %v4016_v7 }
 0x6c8   : > { %v4156_v22 = vpop.eup %4155  ;;  %v2606_v23 = vadd.f32 1.0, %v4154_v20  ;;  %4175 = vpow2.f32 %v3098_v15 }
 0x6c9   : > { %v4158_v25 = vpop.eup %4157  ;;  %v2636_v29 = vmul.f32 %v4156_v22, %v5347_v6 }
 0x6ca   : > { %v4160_v26 = vpop.eup %4159  ;;  %v2637_v27 = vmul.f32 %v4158_v25, %v5350_v10  ;;  %4019 = vmatpush3.bf16.msra.mxu1 %v4018_v19  ;;  %4177 = vrcp.f32 %v2606_v23 }
 0x6cb   : > { %v4162_v28 = vpop.eup %4161  ;;  %v2607_v30 = vadd.f32 1.0, %v4160_v26 }
 0x6cc   : > { %v4164_v32 = vpop.eup %4163  ;;  %v2608_v33 = vadd.f32 1.0, %v4162_v28  ;;  %2744 = vmatprep.mubr.f32.mxu1 %v2637_v27 }
 0x6cd   : > { %v4166_v35 = vpop.eup %4165  ;;  %4179 = vrcp.f32 %v2607_v30  ;;  %2745 = vmatmul.mubr.f32.vlgmr.msra.gmra.mrb[24].mxu1 %v2636_v29  ;;  %v2638_v39 = vmul.f32 %v4164_v32, %v5357_v21 }
 0x6ce   : > { %v4168_v36 = vpop.eup %4167  ;;  %v2639_v37 = vmul.f32 %v4166_v35, %v5360_v24  ;;  %4181 = vrcp.f32 %v2608_v33 }
 0x6cf   : > { %v4170_v38 = vpop.eup %4169  ;;  %v2609_v40 = vadd.f32 1.0, %v4168_v36 }
 0x6d0   : > { %v4172_v10 = vpop.eup %4171  ;;  %v2610_v42 = vadd.f32 1.0, %v4170_v38  ;;  %2749 = vmatprep.mubr.f32.mxu1 %v2639_v37 }
 0x6d1   : > { %v4174_v6 = vpop.eup %4173  ;;  %4183 = vrcp.f32 %v2609_v40  ;;  %2750 = vmatmul.mubr.f32.gmra.mrb[26].mxu1 %v2638_v39  ;;  %v2640_v46 = vmul.f32 %v4172_v10, %v5367_v31 }
 0x6d2   : > { %v4176_v43 = vpop.eup %4175  ;;  %v2641_v44 = vmul.f32 %v4174_v6, %v5370_v34  ;;  %4185 = vrcp.f32 %v2610_v42 }
 0x6d3   : > { %v2611_v47 = vadd.f32 1.0, %v4176_v43 }
 0x6d4   : > { %2754 = vmatprep.mubr.f32.mxu1 %v2641_v44  ;;  %v4178_v24 = vpop.eup %4177 }
 0x6d5   : > { %4187 = vrcp.f32 %v2611_v47  ;;  %2755 = vmatmul.mubr.f32.gmra.mrb[28].mxu1 %v2640_v46  ;;  %v2642_v50 = vmul.f32 %v4178_v24, %v5377_v41 }
 0x6d7   : > { %v4180_v21 = vpop.eup %4179 }
 0x6d8   : > { %v2643_v49 = vmul.f32 %v4180_v21, %v5380_v45  ;;  %v4182_v51 = vpop.eup %4181 }
 0x6d9   : > { %v2644_v34 = vmul.f32 %v4182_v51, %v5387_v56 }
 0x6da   : > { %2759 = vmatprep.mubr.f32.mxu1 %v2643_v49 }
 0x6db   : > { %v4184_v52 = vpop.eup %4183  ;;  %2760 = vmatmul.mubr.f32.gmra.mrb[30].mxu1 %v2642_v50 }
 0x6dc   : > { %v2645_v53 = vmul.f32 %v4184_v52, %v5390_v60  ;;  %v4186_v31 = vpop.eup %4185 }
 0x6dd   : > { %v2646_v57 = vmul.f32 %v4186_v31, %v5397_v48 }
 0x6de   : > { %2764 = vmatprep.mubr.f32.mxu1 %v2645_v53 }
 0x6df   : > { %v4188_v54 = vpop.eup %4187  ;;  %2765 = vmatmul.mubr.f32.gmra.mrb[32].mxu1 %v2644_v34 }
 0x6e0   : > { %v2647_v55 = vmul.f32 %v4188_v54, %v5400_v5 }
 0x6e2   : > { %2769 = vmatprep.mubr.f32.mxu1 %v2647_v55 }
 0x6e3   : > { %2770 = vmatmul.mubr.f32.gmra.mrb[34].mxu1 %v2646_v57 }
 0x780   : > { %v3360_v45 = vpop.f32.mrb[20].mxu1 }
 0x781   : > { %v3361_v41 = vpop.f32.mrb[21].mxu1 }
 0x782   : > { %v3362_v58 = vadd.f32 %v3361_v41, %v3360_v45 }
 0x784   : > { %2429 = vst [vmem:[#allocation2] sm:$0xff] %v3362_v58  ;;  %v3363_v59 = vpop.f32.mrb[22].mxu1 }
 0x785   : > { %v3364_v63 = vpop.f32.mrb[23].mxu1 }
 0x786   : > { %v3365_v2 = vadd.f32 %v3364_v63, %v3363_v59 }
 0x788   : > { %2430 = vst [vmem:[#allocation2 + $0x8] sm:$0xff] %v3365_v2 }
 0x78b   : > { %v2785_v14 = vld [vmem:[#allocation2] sm:$0xff] (!%p3099_p4) }
 0x78c   : > { %2787 = vst [vmem:[#allocation18] sm:$0xff] (!%p3099_p4), %v2785_v14 }
 0x78f   : > { %v2786_v15 = vld [vmem:[#allocation2 + $0x8] sm:$0xff] (!%p3099_p4) }
 0x790   : > { %2788 = vst [vmem:[#allocation18 + $0x8] sm:$0xff] (!%p3099_p4), %v2786_v15 }
 0x7a0   : > { %v3398_v60 = vpop.f32.mrb[24].mxu1 }
 0x7a1   : > { %v3399_v56 = vpop.f32.mrb[25].mxu1 }
 0x7a2   : > { %v3400_v13 = vadd.f32 %v3399_v56, %v3398_v60 }
 0x7a4   : > { %2775 = vst [vmem:[#allocation3] sm:$0xff] %v3400_v13  ;;  %v3401_v61 = vpop.f32.mrb[26].mxu1 }
 0x7a5   : > { %v3402_v62 = vpop.f32.mrb[27].mxu1 }
 0x7a6   : > { %v3403_v11 = vadd.f32 %v3402_v62, %v3401_v61 }
 0x7a8   : > { %2776 = vst [vmem:[#allocation3 + $0x8] sm:$0xff] %v3403_v11  ;;  %v3404_v0 = vpop.f32.mrb[28].mxu1 }
 0x7a9   : > { %v3405_v1 = vpop.f32.mrb[29].mxu1 }
 0x7aa   : > { %v3406_v18 = vadd.f32 %v3405_v1, %v3404_v0 }
 0x7ac   : > { %2777 = vst [vmem:[#allocation3 + $0x10] sm:$0xff] %v3406_v18 }
 0x7ae   : > { %v3407_v48 = vpop.f32.mrb[30].mxu1 }
 0x7af   : > { %v3408_v17 = vpop.f32.mrb[31].mxu1 }
 0x7b0   : > { %v3409_v3 = vadd.f32 %v3408_v17, %v3407_v48 }
 0x7b2   : > { %2778 = vst [vmem:[#allocation3 + $0x18] sm:$0xff] %v3409_v3  ;;  %v3410_v4 = vpop.f32.mrb[32].mxu1 }
 0x7b3   : > { %v3411_v5 = vpop.f32.mrb[33].mxu1 }
 0x7b4   : > { %v3412_v7 = vadd.f32 %v3411_v5, %v3410_v4  ;;  %2784 = sbr.rel (%p3099_p4) target bundleno = 1979 (0x7bb), region = 128 }
 0x7b6   : > { %2779 = vst [vmem:[#allocation3 + $0x20] sm:$0xff] %v3412_v7  ;;  %v3413_v8 = vpop.f32.mrb[34].mxu1 }
 0x7b7   : > { %v3414_v9 = vpop.f32.mrb[35].mxu1 }
 0x7b8   : > { %v3415_v12 = vadd.f32 %v3414_v9, %v3413_v8 }
 0x7ba   : > { %2780 = vst [vmem:[#allocation3 + $0x28] sm:$0xff] %v3415_v12 }
 0x7bb PF: > { %s5539_s0 = sld [smem:[#allocation26_spill]]  ;;  %s4525_s2 = smov [#allocation18]  }
 0x7bc   : > { %s2795_s6 = sshll.u32 %s4525_s2, 4  ;;  %s2796_s6 = int_to_ptr.vmem [resolvable:$true] %s2795_s6 }
 0x7bd   : > { %s4429_s26 = scalar_lea.vmem %s2796_s6, 256  ;;  %p4436_p0 = scmp.lt.s32.totalorder %s2796_s6, %s2796_s6 }
 0x7be   : > { %p4430_p11 = scmp.ne.s32.totalorder %s2796_s6, %s4429_s26  ;;  %p4437_p7 = scmp.lt.s32.totalorder %s4429_s26, %s4429_s26 }
 0x7c0   : > { %p4438_p9 = por %p4437_p7, %p4436_p0 }
 0x7c1   : > { %p4066_p1 = scmp.eq.s32.totalorder %s5539_s0, 2 }
 0x7c3   : > { %p4431_p13 = pnand %p4430_p11, %p4066_p1 }
 0x7c5   : > { %p4432_p2 = pneg %p4431_p13 }
 0x7c7   : > { %p4439_p3 = pnand %p4438_p9, %p4432_p2 }
 0x7c9   : > { %4442 = shalt.err (!%p4439_p3)
}
 0x7ca   : > { %s5540_s5 = sld [smem:[#allocation41_spill]] }
 0x7d0   : > { %s4443_s3 = scalar_lea.hbm %s5540_s5, 256 }
 0x7d1   : > { %p4444_p10 = scmp.ne.s32.totalorder %s5540_s5, %s4443_s3  ;;  %p4449_p6 = scmp.lt.u32.totalorder %s4443_s3, %s5540_s5 }
 0x7d3   : > { %p4445_p5 = pnand %p4444_p10, %p4066_p1 }
 0x7d5   : > { %p4446_p12 = pneg %p4445_p5 }
 0x7d7   : > { %p4451_p8 = pnand %p4449_p6, %p4446_p12 }
 0x7d9   : > { %4454 = shalt.err (!%p4451_p8)
}
 0x7da   : > { %s4526_s28 = smov 128   ;;  %s4527_s1 = smov 8  }
 0x7db   : > { %4037 = dma.vmem_to_hbm [thread:$0]  (%p4066_p1), %s2796_s6, 256, %s5540_s5, [#allocation6], %s4526_s28, %s4526_s28, %s4527_s1  }
 0x7dc   : > { %4492 = dma.done.wait (%p4066_p1), [#allocation6], 256  }
 0x7dd   : > { %4494 = vsyncadd (%p4066_p1), [#allocation6], 4294967040 }
 0x7de PF: > { %s5541_s27 = sld [smem:[#allocation27_spill]]  ;;  %s5542_s29 = sld [smem:[#allocation25_spill]] }
 0x7df   : > { %s5543_s26 = sld [smem:[#allocation28_spill]]  ;;  %s5544_s24 = smov %s4501_s25 }
 0x7e4   : > { %p40_p4 = scmp.ge.s32.totalorder %s5541_s27, 5   ;;  %s5545_s25 = smov %s5542_s29 }
 0x7e6   :  { %42 = sbr.rel (!%p40_p4) target bundleno = 26 (0x1a), region = 218 }
 0x7ed   :  { %2811 = vsyncpa [#allocation5], 1 }
 0x7ee   :  { %2813 = vsyncpa [#allocation5 + $0x1], 1 }
 0x7ef   :  { %2814 = vsyncpa [#allocation8], 1 }
 0x7f0   :  { %2816 = vsyncpa [#allocation8 + $0x1], 1 }
 0x7f1   :  { %2817 = vsyncpa [#allocation11], 1 }
 0x7f2   :  { %2819 = vsyncpa [#allocation11 + $0x1], 1 }
 0x7f3   :  { %2820 = vsyncpa [#allocation14], 1 }
 0x7f4   :  { %2822 = vsyncpa [#allocation14 + $0x1], 1 }
 0x7f5   :  { %2823 = vsyncpa [#allocation17], 1 }
 0x7f6   :  { %2825 = vsyncpa [#allocation17 + $0x1], 1 }
 0x7f7   :  { %2826 = vsyncpa [#allocation6], 1 }
 0x7f8   :  { %2828 = vsyncpa [#allocation6 + $0x1], 1 }

</bundles_post_ra>
